<compile_context>
chip_gen: v6e
topology: v6e:2x2x1
jax: 0.10.0
libtpu: 0.0.40
codegen_flags: <defaults>
</compile_context>

<pallas_src>
import functools

import jax
import jax.numpy as jnp
from jax.experimental import pallas as pl
from jax.experimental.pallas import tpu as pltpu

IN_DIM = 28 * 28   # 784
HID1 = 128
HID2 = 64
OUT_DIM = 10
OUT_PAD = 128      # lane-dense padded output width
DEFAULT_TM = 256   # batch tile: multiple of 256 (v6e/v7x MXU) and 128 (v5e)


def _mlp_kernel(x_ref, w1_ref, b1_ref, w23_ref, b23_ref, out_ref):
    # fc1: (TM, 784) @ (784, 128) on the MXU, fp32 accumulation.
    h1 = jnp.dot(x_ref[...], w1_ref[...], preferred_element_type=jnp.float32)
    h1 = jnp.maximum(h1 + b1_ref[...], 0.0)                    # bias + ReLU (fp32, VPU)
    # fused fc2@fc3, padded to 128 output lanes: (TM, 128) @ (128, 128).
    out = jnp.dot(h1.astype(w23_ref.dtype), w23_ref[...],
                  preferred_element_type=jnp.float32)
    out_ref[...] = (out + b23_ref[...]).astype(out_ref.dtype)  # lane-dense store


def _prepare_params(params, compute_dtype):
    """Fuse fc2/fc3, pad the fused weight/bias to 128 lanes, cast matmul inputs."""
    w1, b1, w2, b2, w3 = params
    w23 = jnp.dot(w2.astype(jnp.float32), w3.astype(jnp.float32))   # (128, 10)
    b23 = jnp.dot(b2.astype(jnp.float32), w3.astype(jnp.float32))   # (1, 10)
    w23p = jnp.zeros((HID1, OUT_PAD), jnp.float32).at[:, :OUT_DIM].set(w23)
    b23p = jnp.zeros((1, OUT_PAD), jnp.float32).at[:, :OUT_DIM].set(b23)
    return (w1.astype(compute_dtype),          # (784, 128) bf16
            b1.astype(jnp.float32),            # (1, 128)   fp32
            w23p.astype(compute_dtype),        # (128, 128) bf16 (cols >=10 are zero)
            b23p)                              # (1, 128)   fp32 (cols >=10 are zero)


@functools.partial(jax.jit, static_argnames=("tm", "compute_dtype"))
def simple_nn_forward(x, params, tm=DEFAULT_TM, compute_dtype=jnp.bfloat16):
    """x: anything that flattens to (-1, 784), e.g. (B, 1, 28, 28). Returns (B, 10) fp32."""
    w1, b1, w23, b23 = _prepare_params(params, compute_dtype)

    x2d = x.reshape(-1, IN_DIM).astype(compute_dtype)
    batch = x2d.shape[0]
    n_tiles = pl.cdiv(batch, tm)
    b_pad = n_tiles * tm
    if b_pad != batch:                                  # pad ragged final tile
        x2d = jnp.pad(x2d, ((0, b_pad - batch), (0, 0)))

    out = pl.pallas_call(
        _mlp_kernel,
        out_shape=jax.ShapeDtypeStruct((b_pad, OUT_PAD), jnp.float32),
        grid=(n_tiles,),
        in_specs=[
            pl.BlockSpec((tm, IN_DIM), lambda i: (i, 0)),       # x: batch-tiled
            pl.BlockSpec((IN_DIM, HID1), lambda i: (0, 0)),     # w1: VMEM-resident
            pl.BlockSpec((1, HID1), lambda i: (0, 0)),          # b1: resident
            pl.BlockSpec((HID1, OUT_PAD), lambda i: (0, 0)),    # fused w2@w3 (padded)
            pl.BlockSpec((1, OUT_PAD), lambda i: (0, 0)),       # fused bias (padded)
        ],
        out_specs=pl.BlockSpec((tm, OUT_PAD), lambda i: (i, 0)),
        compiler_params=pltpu.CompilerParams(
            dimension_semantics=("parallel",)),                 # megacore on v7x
    )(x2d, w1, b1, w23, b23)

    return out[:batch, :OUT_DIM]


def init_params(key):
    """Deterministic init mimicking nn.Linear's uniform(-1/sqrt(fan_in), ...)."""
    def linear(key, fan_in, fan_out, bias=True):
        kw, kb = jax.random.split(key)
        bound = 1.0 / jnp.sqrt(fan_in)
        w = jax.random.uniform(kw, (fan_in, fan_out), jnp.float32, -bound, bound)
        if bias:
            b = jax.random.uniform(kb, (1, fan_out), jnp.float32, -bound, bound)
            return w, b
        return (w,)

    k1, k2, k3 = jax.random.split(key, 3)
    w1, b1 = linear(k1, IN_DIM, HID1)
    w2, b2 = linear(k2, HID1, HID2)
    (w3,) = linear(k3, HID2, OUT_DIM, bias=False)   # fc3 has bias=False
    return w1, b1, w2, b2, w3


def reference_forward_fp32(x, params):
    """Exact PyTorch-module semantics in fp32 (fc1 -> ReLU -> fc2 -> fc3)."""
    w1, b1, w2, b2, w3 = params
    x2d = x.reshape(-1, IN_DIM).astype(jnp.float32)
    h1 = jnp.maximum(x2d @ w1 + b1, 0.0)
    h2 = h1 @ w2 + b2
    return h2 @ w3


def reference_forward_matched(x, params, compute_dtype=jnp.bfloat16):
    """Reference matching the kernel's math (bf16 matmul inputs, fused fc2/fc3)."""
    w1, b1, w2, b2, w3 = params
    x2d = x.reshape(-1, IN_DIM).astype(compute_dtype)
    h1 = jnp.dot(x2d, w1.astype(compute_dtype), preferred_element_type=jnp.float32)
    h1 = jnp.maximum(h1 + b1, 0.0)
    w23 = (w2.astype(jnp.float32) @ w3.astype(jnp.float32)).astype(compute_dtype)
    b23 = b2.astype(jnp.float32) @ w3.astype(jnp.float32)
    out = jnp.dot(h1.astype(compute_dtype), w23,
                  preferred_element_type=jnp.float32) + b23
    return out


if __name__ == "__main__":
    key = jax.random.PRNGKey(0)
    kx, kp = jax.random.split(key)

    # Small MNIST-like batch: (batch=8, channels=1, 28, 28)
    x = jax.random.normal(kx, (8, 1, 28, 28), jnp.float32)
    params = init_params(kp)

    out = simple_nn_forward(x, params)
    out = jax.block_until_ready(out)
    assert out.shape == (8, 10)

    # Tight check against a reference using the kernel's exact precision recipe.
    ref_matched = reference_forward_matched(x, params)
    assert jnp.allclose(out, ref_matched, atol=2e-3, rtol=2e-3)

    # Loose check against the full-fp32 PyTorch semantics (bf16 rounding only).
    ref_fp32 = reference_forward_fp32(x, params)
    assert jnp.allclose(out, ref_fp32, atol=5e-2, rtol=5e-2)

    print("KERNEL_OK")
</pallas_src>

<mosaic_0001>
module attributes {stable_mosaic.version = 11 : i64} {
  func.func @_mlp_kernel(%arg0: i32, %arg1: memref<256x784xbf16, #tpu.memory_space<vmem>>, %arg2: memref<784x128xbf16, #tpu.memory_space<vmem>>, %arg3: memref<1x128xf32, #tpu.memory_space<vmem>>, %arg4: memref<128x128xbf16, #tpu.memory_space<vmem>>, %arg5: memref<1x128xf32, #tpu.memory_space<vmem>>, %arg6: memref<256x128xf32, #tpu.memory_space<vmem>>) attributes {dimension_semantics = [#tpu.dimension_semantics<parallel>], iteration_bounds = array<i64: 1>, scalar_prefetch = 0 : i64, scratch_operands = 0 : i64, tpu.core_type = #tpu.core_type<tc>, window_params = [{transform_indices = @transform_0, window_bounds = array<i64: 256, 784>}, {pipeline_mode = #tpu.pipeline_mode<synchronous>, transform_indices = @transform_1, window_bounds = array<i64: 784, 128>}, {pipeline_mode = #tpu.pipeline_mode<synchronous>, transform_indices = @transform_2, window_bounds = array<i64: 1, 128>}, {pipeline_mode = #tpu.pipeline_mode<synchronous>, transform_indices = @transform_3, window_bounds = array<i64: 128, 128>}, {pipeline_mode = #tpu.pipeline_mode<synchronous>, transform_indices = @transform_4, window_bounds = array<i64: 1, 128>}, {transform_indices = @transform_5, window_bounds = array<i64: 256, 128>}]} {
    %c0 = arith.constant 0 : index
    %c0_0 = arith.constant 0 : index
    %0 = vector.load %arg1[%c0, %c0_0] : memref<256x784xbf16, #tpu.memory_space<vmem>>, vector<256x784xbf16>
    %c0_1 = arith.constant 0 : index
    %c0_2 = arith.constant 0 : index
    %1 = vector.load %arg2[%c0_1, %c0_2] : memref<784x128xbf16, #tpu.memory_space<vmem>>, vector<784x128xbf16>
    %cst = arith.constant dense<0.000000e+00> : vector<256x128xf32>
    %2 = tpu.matmul %0, %1, %cst {dimension_numbers = #tpu.dot_dimension_numbers<[1], [0], [0], [1], [0, 0, 1, 1], [], []>} : vector<256x784xbf16>, vector<784x128xbf16>, vector<256x128xf32> -> vector<256x128xf32>
    %c0_3 = arith.constant 0 : index
    %c0_4 = arith.constant 0 : index
    %3 = vector.load %arg3[%c0_3, %c0_4] : memref<1x128xf32, #tpu.memory_space<vmem>>, vector<1x128xf32>
    %4 = vector.broadcast %3 : vector<1x128xf32> to vector<256x128xf32>
    %5 = arith.addf %2, %4 : vector<256x128xf32>
    %cst_5 = arith.constant 0.000000e+00 : f32
    %6 = vector.broadcast %cst_5 : f32 to vector<256x128xf32>
    %7 = arith.maximumf %5, %6 : vector<256x128xf32>
    %8 = arith.truncf %7 : vector<256x128xf32> to vector<256x128xbf16>
    %c0_6 = arith.constant 0 : index
    %c0_7 = arith.constant 0 : index
    %9 = vector.load %arg4[%c0_6, %c0_7] : memref<128x128xbf16, #tpu.memory_space<vmem>>, vector<128x128xbf16>
    %cst_8 = arith.constant dense<0.000000e+00> : vector<256x128xf32>
    %10 = tpu.matmul %8, %9, %cst_8 {dimension_numbers = #tpu.dot_dimension_numbers<[1], [0], [0], [1], [0, 0, 1, 1], [], []>} : vector<256x128xbf16>, vector<128x128xbf16>, vector<256x128xf32> -> vector<256x128xf32>
    %c0_9 = arith.constant 0 : index
    %c0_10 = arith.constant 0 : index
    %11 = vector.load %arg5[%c0_9, %c0_10] : memref<1x128xf32, #tpu.memory_space<vmem>>, vector<1x128xf32>
    %12 = vector.broadcast %11 : vector<1x128xf32> to vector<256x128xf32>
    %13 = arith.addf %10, %12 : vector<256x128xf32>
    %c0_11 = arith.constant 0 : index
    %c0_12 = arith.constant 0 : index
    %14 = vector.load %arg6[%c0_11, %c0_12] : memref<256x128xf32, #tpu.memory_space<vmem>>, vector<256x128xf32>
    tpu.vector_store %arg6[%c0_11, %c0_12], %13 {strides = array<i32>} : memref<256x128xf32, #tpu.memory_space<vmem>>, vector<256x128xf32>,
    return
  }
  func.func @transform_0(%arg0: i32) -> (i32, i32) {
    %c0_i32 = arith.constant 0 : i32
    %c0_i32_0 = arith.constant 0 : i32
    return %arg0, %c0_i32 : i32, i32
  }
  func.func @transform_1(%arg0: i32) -> (i32, i32) {
    %c0_i32 = arith.constant 0 : i32
    %c0_i32_0 = arith.constant 0 : i32
    %c0_i32_1 = arith.constant 0 : i32
    return %c0_i32, %c0_i32_0 : i32, i32
  }
  func.func @transform_2(%arg0: i32) -> (i32, i32) {
    %c0_i32 = arith.constant 0 : i32
    %c0_i32_0 = arith.constant 0 : i32
    %c0_i32_1 = arith.constant 0 : i32
    return %c0_i32, %c0_i32_0 : i32, i32
  }
  func.func @transform_3(%arg0: i32) -> (i32, i32) {
    %c0_i32 = arith.constant 0 : i32
    %c0_i32_0 = arith.constant 0 : i32
    %c0_i32_1 = arith.constant 0 : i32
    return %c0_i32, %c0_i32_0 : i32, i32
  }
  func.func @transform_4(%arg0: i32) -> (i32, i32) {
    %c0_i32 = arith.constant 0 : i32
    %c0_i32_0 = arith.constant 0 : i32
    %c0_i32_1 = arith.constant 0 : i32
    return %c0_i32, %c0_i32_0 : i32, i32
  }
  func.func @transform_5(%arg0: i32) -> (i32, i32) {
    %c0_i32 = arith.constant 0 : i32
    %c0_i32_0 = arith.constant 0 : i32
    return %arg0, %c0_i32 : i32, i32
  }
}

</mosaic_0001>

<bundles_post_ra>
// kernel: simple_nn_forward.1
= control target key start
LH: loop header
LB: loop body
LE: loop exit
PB: predicated region body
PF: predicated region fallthrough
CT: control target
= control target key end

     0   :  { %vm1108_vm0 = vcmask 130048   ;;  %s3799_s1 = inlined_call_operand.vmem [shape: bf16[784,128], index: 1, kind: input, shape index: {}]   ;;  %s3800_s0 = inlined_call_operand.vmem [shape: bf16[256,784], index: 0, kind: input, shape index: {}]   ;;  %s3801_s3 = inlined_call_operand.vmem [shape: bf16[128,128], index: 3, kind: input, shape index: {}]   ;;  %s3802_s2 = inlined_call_operand.vmem [shape: f32[1,128], index: 2, kind: input, shape index: {}]   ;;  %s3803_s4 = inlined_call_operand.vmem [shape: f32[1,128], index: 4, kind: input, shape index: {}]   ;;  %s3804_s5 = inlined_call_operand.vmem [shape: f32[256,128], index: 5, kind: output, shape index: {}]  }
   0x1   :  { %v2763_v0 = vld [vmem:[%s3799_s1 + $0x78] sm:$0xff]   ;;  %v2767_v4 = vld [vmem:[%s3799_s1 + $0x70] sm:$0xff]   ;;  %v2771_v8 = vld [vmem:[%s3799_s1 + $0x68] sm:$0xff]  }
   0x2   :  { %v2764_v1 = vld [vmem:[%s3799_s1 + $0x38] sm:$0xff]   ;;  %2304 = vmatprep.subr.bf16.mxu0 %v2763_v0  ;;  %v2768_v5 = vld [vmem:[%s3799_s1 + $0x30] sm:$0xff]   ;;  %v2772_v9 = vld [vmem:[%s3799_s1 + $0x28] sm:$0xff]  }
   0x3   :  { %v2765_v2 = vld [vmem:[%s3799_s1 + $0xf8] sm:$0xff]   ;;  %2305 = vmatpush3.bf16.msra.mxu0 %v2764_v1  ;;  %v2769_v6 = vld [vmem:[%s3799_s1 + $0xf0] sm:$0xff]   ;;  %v2773_v10 = vld [vmem:[%s3799_s1 + $0xe8] sm:$0xff]  }
   0x4   :  { %v2766_v3 = vld [vmem:[%s3799_s1 + $0xb8] sm:$0xff]   ;;  %2416 = vmatprep.subr.bf16.mxu1 %v2765_v2  ;;  %2306 = vmatprep.subr.bf16.mxu0 %v2767_v4  ;;  %v2770_v7 = vld [vmem:[%s3799_s1 + $0xb0] sm:$0xff]   ;;  %v2774_v11 = vld [vmem:[%s3799_s1 + $0xa8] sm:$0xff]  }
   0x5   :  { %2417 = vmatpush3.bf16.msra.mxu1 %v2766_v3  ;;  %v2775_v12 = vld [vmem:[%s3799_s1 + $0x60] sm:$0xff]   ;;  %v2779_v16 = vld [vmem:[%s3799_s1 + $0x58] sm:$0xff]   ;;  %v2783_v20 = vld [vmem:[%s3799_s1 + $0x50] sm:$0xff]  }
   0x6   :  { %2418 = vmatprep.subr.bf16.mxu1 %v2769_v6  ;;  %v2776_v13 = vld [vmem:[%s3799_s1 + $0x20] sm:$0xff]   ;;  %v2780_v17 = vld [vmem:[%s3799_s1 + $0x18] sm:$0xff]   ;;  %v2784_v21 = vld [vmem:[%s3799_s1 + $0x10] sm:$0xff]  }
   0x7   :  { %2307 = vmatpush3.bf16.msra.mxu0 %v2768_v5  ;;  %v2777_v14 = vld [vmem:[%s3799_s1 + $0xe0] sm:$0xff]   ;;  %v2781_v18 = vld [vmem:[%s3799_s1 + $0xd8] sm:$0xff]   ;;  %v2785_v22 = vld [vmem:[%s3799_s1 + $0xd0] sm:$0xff]  }
   0x8   :  { %2308 = vmatprep.subr.bf16.mxu0 %v2771_v8  ;;  %v2778_v15 = vld [vmem:[%s3799_s1 + $0xa0] sm:$0xff]   ;;  %v2782_v19 = vld [vmem:[%s3799_s1 + $0x98] sm:$0xff]   ;;  %v2786_v23 = vld [vmem:[%s3799_s1 + $0x90] sm:$0xff]  }
   0x9   :  { %2419 = vmatpush3.bf16.msra.mxu1 %v2770_v7  ;;  %v2787_v24 = vld [vmem:[%s3799_s1 + $0x48] sm:$0xff]   ;;  %v2791_v28 = vld [vmem:[%s3799_s1 + $0x40] sm:$0xff]   ;;  %v2798_v34 = vld [vmem:[%s3799_s1 + $0x178] sm:$0xff]  }
   0xa   :  { %2420 = vmatprep.subr.bf16.mxu1 %v2773_v10  ;;  %v2788_v25 = vld [vmem:[%s3799_s1 + $0x8] sm:$0xff]   ;;  %v2792_v29 = vld [vmem:[%s3799_s1] sm:$0xff]   ;;  %v2802_v37 = vld [vmem:[%s3799_s1 + $0x138] sm:$0xff]  }
   0xb   :  { %2309 = vmatpush3.bf16.msra.mxu0 %v2772_v9  ;;  %v2789_v26 = vld [vmem:[%s3799_s1 + $0xc8] sm:$0xff]   ;;  %v2793_v30 = vld [vmem:[%s3799_s1 + $0xc0] sm:$0xff]   ;;  %v2803_v38 = vld [vmem:[%s3800_s0 + $0x3c] ss:$28 sps:$4 sm:$0xff]  }
   0xc   :  { %2310 = vmatprep.subr.bf16.mxu0 %v2775_v12  ;;  %v2790_v27 = vld [vmem:[%s3799_s1 + $0x88] sm:$0xff]   ;;  %v2794_v31 = vld [vmem:[%s3800_s0] ss:$28 sps:$4 sm:$0xff]   ;;  %v2805_v40 = vld [vmem:[%s3800_s0 + $0x38] ss:$28 sps:$4 sm:$0xff]  }
   0xd   :  { %2421 = vmatpush3.bf16.msra.mxu1 %v2774_v11  ;;  %v2796_v32 = vld [vmem:[%s3800_s0 + $0x4] ss:$28 sps:$4 sm:$0xff]   ;;  %v2801_v36 = vld [vmem:[%s3800_s0 + $0xc] ss:$28 sps:$4 sm:$0xff]   ;;  %v2809_v41 = vld [vmem:[%s3800_s0 + $0x74] ss:$28 sps:$4 sm:$0xff]  }
   0xe   :  { %2422 = vmatprep.subr.bf16.mxu1 %v2777_v14  ;;  %v2797_v33 = vld [vmem:[%s3799_s1 + $0x80] sm:$0xff]   ;;  %1189 = vmatprep.mubr.bf16.mxu0 %v2796_v32  ;;  %v2812_v42 = vld [vmem:[%s3799_s1 + $0x170] sm:$0xff]   ;;  %v2813_v44 = vld [vmem:[%s3800_s0 + $0x7c] ss:$28 sps:$4 sm:$0xff]  }
   0xf   :  { %2311 = vmatpush3.bf16.msra.mxu0 %v2776_v13  ;;  %v2799_v35 = vld [vmem:[%s3800_s0 + $0x8] ss:$28 sps:$4 sm:$0xff]   ;;  %1350 = vmatprep.mubr.bf16.mxu1 %v2801_v36  ;;  %v2808_v43 = vld [vmem:[%s3800_s0 + $0x40] ss:$28 sps:$4 sm:$0xff]   ;;  %v2815_v45 = vld [vmem:[%s3799_s1 + $0x130] sm:$0xff]  }
  0x10   :  { %2312 = vmatprep.subr.bf16.mxu0 %v2779_v16  ;;  %v2806_v39 = vld [vmem:[%s3800_s0 + $0x44] ss:$28 sps:$4 sm:$0xff]   ;;  %v2811_v46 = vld [vmem:[%s3800_s0 + $0x70] ss:$28 sps:$4 sm:$0xff]   ;;  %v2816_v49 = vld [vmem:[%s3800_s0 + $0x78] ss:$28 sps:$4 sm:$0xff]  }
  0x11   :  { %2423 = vmatpush3.bf16.msra.mxu1 %v2778_v15  ;;  %v2817_v47 = vld [vmem:[%s3800_s0 + $0xac] ss:$28 sps:$4 sm:$0xff]   ;;  %v2820_v51 = vld [vmem:[%s3800_s0 + $0xb4] ss:$28 sps:$4 sm:$0xff]   ;;  %v2823_v53 = vld [vmem:[%s3800_s0 + $0xe4] ss:$28 sps:$4 sm:$0xff]  }
  0x12   :  { %2424 = vmatprep.subr.bf16.mxu1 %v2781_v18  ;;  %v2826_v48 = vld [vmem:[%s3799_s1 + $0x168] sm:$0xff]   ;;  %v2840_v54 = vld [vmem:[%s3799_s1 + $0x160] sm:$0xff]   ;;  %v2854_v59 = vld [vmem:[%s3799_s1 + $0x158] sm:$0xff]  }
  0x13   :  { %2313 = vmatpush3.bf16.msra.mxu0 %v2780_v17  ;;  %v2829_v50 = vld [vmem:[%s3799_s1 + $0x128] sm:$0xff]   ;;  %v2843_v56 = vld [vmem:[%s3799_s1 + $0x120] sm:$0xff]   ;;  %v2831_v60 = vld [vmem:[%s3800_s0 + $0x11c] ss:$28 sps:$4 sm:$0xff]  }
  0x14   :  { %2314 = vmatprep.subr.bf16.mxu0 %v2783_v20  ;;  %v2819_v52 = vld [vmem:[%s3800_s0 + $0xa8] ss:$28 sps:$4 sm:$0xff]   ;;  %v2822_v55 = vld [vmem:[%s3800_s0 + $0xb0] ss:$28 sps:$4 sm:$0xff]   ;;  %v2825_v58 = vld [vmem:[%s3800_s0 + $0xe0] ss:$28 sps:$4 sm:$0xff]  }
  0x15   :  { %2425 = vmatpush3.bf16.msra.mxu1 %v2782_v19  ;;  %v2827_v57 = vld [vmem:[%s3800_s0 + $0xec] ss:$28 sps:$4 sm:$0xff]   ;;  %v2857_v62 = vld [vmem:[%s3799_s1 + $0x118] sm:$0xff]   ;;  %v2859_v63 = vld [vmem:[%s3799_s1 + $0x180] sm:$0xff]  }
  0x16   :  { %2426 = vmatprep.subr.bf16.mxu1 %v2785_v22  ;;  %v2830_v61 = vld [vmem:[%s3800_s0 + $0xe8] ss:$28 sps:$4 sm:$0xff]   ;;  %v2833_v1 = vld [vmem:[%s3800_s0 + $0x118] ss:$28 sps:$4 sm:$0xff]   ;;  %v2836_v5 = vld [vmem:[%s3800_s0 + $0x120] ss:$28 sps:$4 sm:$0xff]  }
  0x17   :  { %2315 = vmatpush3.bf16.msra.mxu0 %v2784_v21  ;;  %v2834_v0 = vld [vmem:[%s3800_s0 + $0x124] ss:$28 sps:$4 sm:$0xff]   ;;  %v2869_v2 = vld [vmem:[%s3799_s1 + $0x150] sm:$0xff]   ;;  %v2841_v6 = vld [vmem:[%s3800_s0 + $0x15c] ss:$28 sps:$4 sm:$0xff]  }
  0x18   :  { %2316 = vmatprep.subr.bf16.mxu0 %v2787_v24  ;;  %v2837_v3 = vld [vmem:[%s3800_s0 + $0x154] ss:$28 sps:$4 sm:$0xff]   ;;  %v2883_v8 = vld [vmem:[%s3799_s1 + $0x148] sm:$0xff]   ;;  %v2897_v13 = vld [vmem:[%s3799_s1 + $0x140] sm:$0xff]  }
  0x19   :  { %2427 = vmatpush3.bf16.msra.mxu1 %v2786_v23  ;;  %v2872_v4 = vld [vmem:[%s3799_s1 + $0x110] sm:$0xff]   ;;  %v2845_v9 = vld [vmem:[%s3800_s0 + $0x18c] ss:$28 sps:$4 sm:$0xff]   ;;  %v2851_v15 = vld [vmem:[%s3800_s0 + $0x1c4] ss:$28 sps:$4 sm:$0xff]  }
  0x1a   :  { %2428 = vmatprep.subr.bf16.mxu1 %v2789_v26  ;;  %v2839_v7 = vld [vmem:[%s3800_s0 + $0x150] ss:$28 sps:$4 sm:$0xff]   ;;  %v2844_v11 = vld [vmem:[%s3800_s0 + $0x158] ss:$28 sps:$4 sm:$0xff]   ;;  %v2847_v14 = vld [vmem:[%s3800_s0 + $0x188] ss:$28 sps:$4 sm:$0xff]  }
  0x1b   :  { %2317 = vmatpush3.bf16.msra.mxu0 %v2788_v25  ;;  %v2886_v10 = vld [vmem:[%s3799_s1 + $0x108] sm:$0xff]   ;;  %v2848_v12 = vld [vmem:[%s3800_s0 + $0x194] ss:$28 sps:$4 sm:$0xff]   ;;  %v2900_v16 = vld [vmem:[%s3799_s1 + $0x100] sm:$0xff]  }
  0x1c   :  { %2318 = vmatprep.subr.bf16.mxu0 %v2791_v28  ;;  %v2850_v17 = vld [vmem:[%s3800_s0 + $0x190] ss:$28 sps:$4 sm:$0xff]   ;;  %v2853_v19 = vld [vmem:[%s3800_s0 + $0x1c0] ss:$28 sps:$4 sm:$0xff]   ;;  %v2858_v21 = vld [vmem:[%s3800_s0 + $0x1c8] ss:$28 sps:$4 sm:$0xff]  }
  0x1d   :  { %2429 = vmatpush3.bf16.msra.mxu1 %v2790_v27  ;;  %v2855_v18 = vld [vmem:[%s3800_s0 + $0x1cc] ss:$28 sps:$4 sm:$0xff]   ;;  %v2860_v20 = vld [vmem:[%s3800_s0 + $0x1fc] ss:$28 sps:$4 sm:$0xff]   ;;  %v2863_v22 = vld [vmem:[%s3800_s0 + $0x204] ss:$28 sps:$4 sm:$0xff]  }
  0x1e   :  { %2430 = vmatprep.subr.bf16.mxu1 %v2793_v30  ;;  %v2862_v23 = vld [vmem:[%s3800_s0 + $0x1f8] ss:$28 sps:$4 sm:$0xff]   ;;  %v2865_v25 = vld [vmem:[%s3800_s0 + $0x200] ss:$28 sps:$4 sm:$0xff]   ;;  %v2868_v27 = vld [vmem:[%s3800_s0 + $0x230] ss:$28 sps:$4 sm:$0xff]  }
  0x1f   :  { %2319 = vmatpush3.bf16.msra.mxu0 %v2792_v29  ;;  %v2866_v24 = vld [vmem:[%s3800_s0 + $0x234] ss:$28 sps:$4 sm:$0xff]   ;;  %v2870_v26 = vld [vmem:[%s3800_s0 + $0x23c] ss:$28 sps:$4 sm:$0xff]   ;;  %v2874_v28 = vld [vmem:[%s3800_s0 + $0x26c] ss:$28 sps:$4 sm:$0xff]  }
  0x20   :  { %2528 = vmatprep.subr.bf16.mxu0 %v2798_v34  ;;  %v2873_v29 = vld [vmem:[%s3800_s0 + $0x238] ss:$28 sps:$4 sm:$0xff]   ;;  %v2880_v32 = vld [vmem:[%s3800_s0 + $0x2a4] ss:$28 sps:$4 sm:$0xff]   ;;  %v2884_v34 = vld [vmem:[%s3800_s0 + $0x2ac] ss:$28 sps:$4 sm:$0xff]  }
  0x21   :  { %2431 = vmatpush3.bf16.msra.mxu1 %v2797_v33  ;;  %v2877_v30 = vld [vmem:[%s3800_s0 + $0x274] ss:$28 sps:$4 sm:$0xff]   ;;  %v2888_v36 = vld [vmem:[%s3800_s0 + $0x2dc] ss:$28 sps:$4 sm:$0xff]  }
  0x22   :  { %1190 = vmatmul.mubr.bf16.vlgmr.msra.gmra.mxu0 %v2794_v31  ;;  %2681 = vmatprep.subr.bf16.mxu1 %v2859_v63  ;;  %v2876_v31 = vld [vmem:[%s3800_s0 + $0x268] ss:$28 sps:$4 sm:$0xff]   ;;  %v2879_v33 = vld [vmem:[%s3800_s0 + $0x270] ss:$28 sps:$4 sm:$0xff]  }
  0x23   :  { %2529 = vmatpush3.bf16.msra.mxu0 %v2802_v37  ;;  %1197 = vmatprep.mubr.bf16.mxu0 %v2803_v38  ;;  %v2887_v37 = vld [vmem:[%s3800_s0 + $0x2a8] ss:$28 sps:$4 sm:$0xff]  }
  0x24   :  { %1351 = vmatmul.mubr.bf16.vlgmr.msra.gmra.mxu1 %v2799_v35  ;;  %2530 = vmatprep.subr.bf16.mxu0 %v2812_v42  ;;  %v2882_v35 = vld [vmem:[%s3800_s0 + $0x2a0] ss:$28 sps:$4 sm:$0xff]  }
  0x25   :  { %1358 = vmatprep.mubr.bf16.mxu1 %v2806_v39  ;;  %2682 = vmatpush3.bf16.msra.mxu1 %v2859_v63  ;;  %v2891_v38 = vld [vmem:[%s3800_s0 + $0x2e4] ss:$28 sps:$4 sm:$0xff]   ;;  %v2890_v39 = vld [vmem:[%s3800_s0 + $0x2d8] ss:$28 sps:$4 sm:$0xff]  }
  0x26   :  { %v2898_v42 = vld [vmem:[%s3800_s0 + $0x31c] ss:$28 sps:$4 sm:$0xff]  }
  0x27   :  { %2531 = vmatpush3.bf16.msra.mxu0 %v2815_v45  ;;  %v2901_v45 = vld [vmem:[%s3800_s0 + $0x318] ss:$28 sps:$4 sm:$0xff]  }
  0x28   :  { %2532 = vmatprep.subr.bf16.mxu0 %v2826_v48  ;;  %v2910_v48 = vld [vmem:[%s3800_s0 + $0x14] ss:$28 sps:$4 sm:$0xff]  }
  0x29   :  { %v2923_v63 = vld [vmem:[%s3800_s0 + $0xb8] ss:$28 sps:$4 sm:$0xff]  }
  0x2a   :  { %1198 = vmatmul.mubr.bf16.gmra.mxu0 %v2805_v40  ;;  %v2894_v40 = vld [vmem:[%s3800_s0 + $0x314] ss:$28 sps:$4 sm:$0xff]  }
  0x2b   :  { %1205 = vmatprep.mubr.bf16.mxu0 %v2809_v41  ;;  %2533 = vmatpush3.bf16.msra.mxu0 %v2829_v50  ;;  %v2893_v41 = vld [vmem:[%s3800_s0 + $0x2e0] ss:$28 sps:$4 sm:$0xff]   ;;  %v2911_v50 = vld [vmem:[%s3800_s0 + $0x18] ss:$28 sps:$4 sm:$0xff]  }
  0x2c   :  { %1359 = vmatmul.mubr.bf16.gmra.mxu1 %v2808_v43  ;;  %2534 = vmatprep.subr.bf16.mxu0 %v2840_v54  ;;  %v2896_v43 = vld [vmem:[%s3800_s0 + $0x310] ss:$28 sps:$4 sm:$0xff]   ;;  %v2919_v54 = vld [vmem:[%s3800_s0 + $0x88] ss:$28 sps:$4 sm:$0xff]  }
  0x2d   :  { %1366 = vmatprep.mubr.bf16.mxu1 %v2813_v44  ;;  %v2902_v44 = vld [vmem:[%s3800_s0 + $0x34c] ss:$28 sps:$4 sm:$0xff]  }
  0x2f   :  { %2535 = vmatpush3.bf16.msra.mxu0 %v2843_v56  ;;  %v2916_v56 = vld [vmem:[%s3800_s0 + $0x84] ss:$28 sps:$4 sm:$0xff]  }
  0x30   :  { %2536 = vmatprep.subr.bf16.mxu0 %v2854_v59  ;;  %v2918_v59 = vld [vmem:[%s3800_s0 + $0x80] ss:$28 sps:$4 sm:$0xff]  }
  0x32   :  { %1206 = vmatmul.mubr.bf16.gmra.mxu0 %v2811_v46  ;;  %v2905_v46 = vld [vmem:[%s3800_s0 + $0x354] ss:$28 sps:$4 sm:$0xff]  }
  0x33   :  { %1213 = vmatprep.mubr.bf16.mxu0 %v2817_v47  ;;  %2537 = vmatpush3.bf16.msra.mxu0 %v2857_v62  ;;  %v2904_v47 = vld [vmem:[%s3800_s0 + $0x348] ss:$28 sps:$4 sm:$0xff]  }
  0x34   :  { %1367 = vmatmul.mubr.bf16.gmra.mxu1 %v2816_v49  ;;  %2538 = vmatprep.subr.bf16.mxu0 %v2869_v2  ;;  %v2907_v49 = vld [vmem:[%s3800_s0 + $0x350] ss:$28 sps:$4 sm:$0xff]   ;;  %v2935_v62 = vld [vmem:[%s3800_s0 + $0x168] ss:$28 sps:$4 sm:$0xff]   ;;  %v2943_v2 = vld [vmem:[%s3800_s0 + $0x1d8] ss:$28 sps:$4 sm:$0xff]  }
  0x35   :  { %1374 = vmatprep.mubr.bf16.mxu1 %v2820_v51  ;;  %v2908_v51 = vld [vmem:[%s3800_s0 + $0x10] ss:$28 sps:$4 sm:$0xff]  }
  0x37   :  { %2539 = vmatpush3.bf16.msra.mxu0 %v2872_v4  ;;  %v2929_v4 = vld [vmem:[%s3800_s0 + $0x12c] ss:$28 sps:$4 sm:$0xff]  }
  0x38   :  { %2540 = vmatprep.subr.bf16.mxu0 %v2883_v8  ;;  %v2932_v8 = vld [vmem:[%s3800_s0 + $0x164] ss:$28 sps:$4 sm:$0xff]  }
  0x3a   :  { %1214 = vmatmul.mubr.bf16.gmra.mxu0 %v2819_v52  ;;  %v2913_v52 = vld [vmem:[%s3800_s0 + $0x4c] ss:$28 sps:$4 sm:$0xff]  }
  0x3b   :  { %1221 = vmatprep.mubr.bf16.mxu0 %v2823_v53  ;;  %2541 = vmatpush3.bf16.msra.mxu0 %v2886_v10  ;;  %v2912_v53 = vld [vmem:[%s3800_s0 + $0x50] ss:$28 sps:$4 sm:$0xff]   ;;  %v2959_v10 = vld [vmem:[%s3800_s0 + $0x2b8] ss:$28 sps:$4 sm:$0xff]  }
  0x3c   :  { %1375 = vmatmul.mubr.bf16.gmra.mxu1 %v2822_v55  ;;  %2542 = vmatprep.subr.bf16.mxu0 %v2897_v13  ;;  %v2915_v55 = vld [vmem:[%s3800_s0 + $0x48] ss:$28 sps:$4 sm:$0xff]   ;;  %v2960_v13 = vld [vmem:[%s3800_s0 + $0x2f0] ss:$28 sps:$4 sm:$0xff]  }
  0x3d   :  { %1382 = vmatprep.mubr.bf16.mxu1 %v2827_v57  ;;  %v2920_v57 = vld [vmem:[%s3800_s0 + $0xc0] ss:$28 sps:$4 sm:$0xff]  }
  0x3f   :  { %2543 = vmatpush3.bf16.msra.mxu0 %v2900_v16  ;;  %v2940_v16 = vld [vmem:[%s3800_s0 + $0x1d4] ss:$28 sps:$4 sm:$0xff]  }
  0x42   :  { %1222 = vmatmul.mubr.bf16.gmra.mxu0 %v2825_v58  ;;  %v2927_v58 = vld [vmem:[%s3800_s0 + $0xf8] ss:$28 sps:$4 sm:$0xff]  }
  0x43   :  { %1229 = vmatprep.mubr.bf16.mxu0 %v2831_v60  ;;  %v2921_v60 = vld [vmem:[%s3800_s0 + $0xbc] ss:$28 sps:$4 sm:$0xff]  }
  0x44   :  { %1383 = vmatmul.mubr.bf16.gmra.mxu1 %v2830_v61  ;;  %v2928_v61 = vld [vmem:[%s3800_s0 + $0x130] ss:$28 sps:$4 sm:$0xff]  }
  0x45   :  { %1390 = vmatprep.mubr.bf16.mxu1 %v2834_v0  ;;  %v2924_v0 = vld [vmem:[%s3800_s0 + $0xf4] ss:$28 sps:$4 sm:$0xff]  }
  0x4a   :  { %1230 = vmatmul.mubr.bf16.gmra.mxu0 %v2833_v1  ;;  %v2936_v1 = vld [vmem:[%s3800_s0 + $0x1a0] ss:$28 sps:$4 sm:$0xff]  }
  0x4b   :  { %1237 = vmatprep.mubr.bf16.mxu0 %v2837_v3  ;;  %v2926_v3 = vld [vmem:[%s3800_s0 + $0xf0] ss:$28 sps:$4 sm:$0xff]  }
  0x4c   :  { %1391 = vmatmul.mubr.bf16.gmra.mxu1 %v2836_v5  ;;  %v2944_v5 = vld [vmem:[%s3800_s0 + $0x210] ss:$28 sps:$4 sm:$0xff]  }
  0x4d   :  { %1398 = vmatprep.mubr.bf16.mxu1 %v2841_v6  ;;  %v2951_v6 = vld [vmem:[%s3800_s0 + $0x248] ss:$28 sps:$4 sm:$0xff]  }
  0x52   :  { %1238 = vmatmul.mubr.bf16.gmra.mxu0 %v2839_v7  ;;  %v2931_v7 = vld [vmem:[%s3800_s0 + $0x128] ss:$28 sps:$4 sm:$0xff]  }
  0x53   :  { %1245 = vmatprep.mubr.bf16.mxu0 %v2845_v9  ;;  %v2952_v9 = vld [vmem:[%s3800_s0 + $0x280] ss:$28 sps:$4 sm:$0xff]  }
  0x54   :  { %1399 = vmatmul.mubr.bf16.gmra.mxu1 %v2844_v11  ;;  %v2934_v11 = vld [vmem:[%s3800_s0 + $0x160] ss:$28 sps:$4 sm:$0xff]  }
  0x55   :  { %1406 = vmatprep.mubr.bf16.mxu1 %v2848_v12  ;;  %v2937_v12 = vld [vmem:[%s3800_s0 + $0x19c] ss:$28 sps:$4 sm:$0xff]  }
  0x5a   :  { %1246 = vmatmul.mubr.bf16.gmra.mxu0 %v2847_v14  ;;  %v2967_v14 = vld [vmem:[%s3800_s0 + $0x328] ss:$28 sps:$4 sm:$0xff]  }
  0x5b   :  { %1253 = vmatprep.mubr.bf16.mxu0 %v2851_v15  ;;  %v2939_v15 = vld [vmem:[%s3800_s0 + $0x198] ss:$28 sps:$4 sm:$0xff]  }
  0x5c   :  { %1407 = vmatmul.mubr.bf16.gmra.mxu1 %v2850_v17  ;;  %v2968_v17 = vld [vmem:[%s3800_s0 + $0x360] ss:$28 sps:$4 sm:$0xff]  }
  0x5d   :  { %1414 = vmatprep.mubr.bf16.mxu1 %v2855_v18  ;;  %v2972_v18 = vld [vmem:[%s3801_s3 + $0x38] sm:$0xff]  }
  0x5e   :  { %2715 = vmatprep.subr.bf16.mxu1 %v2972_v18 }
  0x62   :  { %1254 = vmatmul.mubr.bf16.gmra.mxu0 %v2853_v19  ;;  %v2942_v19 = vld [vmem:[%s3800_s0 + $0x1d0] ss:$28 sps:$4 sm:$0xff]  }
  0x63   :  { %1261 = vmatprep.mubr.bf16.mxu0 %v2860_v20  ;;  %v2945_v20 = vld [vmem:[%s3800_s0 + $0x20c] ss:$28 sps:$4 sm:$0xff]  }
  0x64   :  { %1415 = vmatmul.mubr.bf16.gmra.mxu1 %v2858_v21  ;;  %v2973_v21 = vld [vmem:[%s3801_s3 + $0x30] sm:$0xff]  }
  0x65   :  { %1422 = vmatprep.mubr.bf16.mxu1 %v2863_v22 }
  0x6a   :  { %1262 = vmatmul.mubr.bf16.gmra.mxu0 %v2862_v23  ;;  %v2974_v23 = vld [vmem:[%s3801_s3 + $0x28] sm:$0xff]  }
  0x6b   :  { %1269 = vmatprep.mubr.bf16.mxu0 %v2866_v24  ;;  %v3482_v24 = vld [vmem:[%s3802_s2] ss:$0 sm:$0xff] }
  0x6c   :  { %1423 = vmatmul.mubr.bf16.gmra.mxu1 %v2865_v25 }
  0x6d   :  { %1430 = vmatprep.mubr.bf16.mxu1 %v2870_v26 }
  0x72   :  { %1270 = vmatmul.mubr.bf16.gmra.mxu0 %v2868_v27 }
  0x73   :  { %1277 = vmatprep.mubr.bf16.mxu0 %v2874_v28 }
  0x74   :  { %1431 = vmatmul.mubr.bf16.gmra.mxu1 %v2873_v29  ;;  %v2947_v29 = vld [vmem:[%s3800_s0 + $0x208] ss:$28 sps:$4 sm:$0xff]  }
  0x75   :  { %1438 = vmatprep.mubr.bf16.mxu1 %v2877_v30  ;;  %v2975_v30 = vld [vmem:[%s3801_s3 + $0x20] sm:$0xff]  }
  0x7a   :  { %1278 = vmatmul.mubr.bf16.gmra.mxu0 %v2876_v31 }
  0x7b   :  { %1285 = vmatprep.mubr.bf16.mxu0 %v2880_v32 }
  0x7c   :  { %1439 = vmatmul.mubr.bf16.gmra.mxu1 %v2879_v33  ;;  %v2948_v33 = vld [vmem:[%s3800_s0 + $0x244] ss:$28 sps:$4 sm:$0xff]  }
  0x7d   :  { %1446 = vmatprep.mubr.bf16.mxu1 %v2884_v34 }
  0x82   :  { %1286 = vmatmul.mubr.bf16.gmra.mxu0 %v2882_v35 }
  0x83   :  { %1293 = vmatprep.mubr.bf16.mxu0 %v2888_v36 }
  0x84   :  { %1447 = vmatmul.mubr.bf16.gmra.mxu1 %v2887_v37 }
  0x85   :  { %1454 = vmatprep.mubr.bf16.mxu1 %v2891_v38 }
  0x8a   :  { %1294 = vmatmul.mubr.bf16.gmra.mxu0 %v2890_v39 }
  0x8b   :  { %1301 = vmatprep.mubr.bf16.mxu0 %v2894_v40  ;;  %v2976_v40 = vld [vmem:[%s3801_s3 + $0x18] sm:$0xff]  }
  0x8c   :  { %1455 = vmatmul.mubr.bf16.gmra.mxu1 %v2893_v41 }
  0x8d   :  { %1462 = vmatprep.mubr.bf16.mxu1 %v2898_v42 }
  0x92   :  { %1302 = vmatmul.mubr.bf16.gmra.mxu0 %v2896_v43 }
  0x93   :  { %1309 = vmatprep.mubr.bf16.mxu0 %v2902_v44 }
  0x94   :  { %1463 = vmatmul.mubr.bf16.gmra.mxu1 %v2901_v45 }
  0x95   :  { %1470 = vmatprep.mubr.bf16.mxu1 %v2905_v46 }
  0x9a   :  { %1310 = vmatmul.mubr.bf16.gmra.mxu0 %v2904_v47 }
  0x9b   :  { %1511 = vmatprep.mubr.bf16.mxu0 %v2910_v48 }
  0x9c   :  { %1471 = vmatmul.mubr.bf16.gmra.mxu1 %v2907_v49  ;;  %v2950_v49 = vld [vmem:[%s3800_s0 + $0x240] ss:$28 sps:$4 sm:$0xff]  }
  0x9d   :  { %2683 = vmatprep.mubr.msk.bf16.mxu1 %vm1108_vm0, %v2911_v50  ;;  %v2977_v50 = vld [vmem:[%s3801_s3 + $0x10] sm:$0xff]  }
  0xa2   :  { %1512 = vmatmul.mubr.bf16.vlgmr.msra.gmra.mxu0 %v2908_v51 }
  0xa3   :  { %1519 = vmatprep.mubr.bf16.mxu0 %v2913_v52 }
  0xa4   :  { %2684 = vmatmul.mubr.msk.bf16.vlgmr.msra.gmra.mxu1 %vm1108_vm0, %v2912_v53  ;;  %v2953_v53 = vld [vmem:[%s3800_s0 + $0x27c] ss:$28 sps:$4 sm:$0xff]  }
  0xa5   :  { %2687 = vmatprep.mubr.msk.bf16.mxu1 %vm1108_vm0, %v2919_v54  ;;  %2716 = vmatpush3.bf16.msra.mxu1 %v2972_v18 }
  0xa6   :  { %2717 = vmatprep.subr.bf16.mxu1 %v2973_v21 }
  0xa9   :  { %2718 = vmatpush3.bf16.msra.mxu1 %v2973_v21 }
  0xaa   :  { %1520 = vmatmul.mubr.bf16.gmra.mxu0 %v2915_v55  ;;  %2719 = vmatprep.subr.bf16.mxu1 %v2974_v23 }
  0xab   :  { %1527 = vmatprep.mubr.bf16.mxu0 %v2916_v56 }
  0xac   :  { %2688 = vmatmul.mubr.msk.bf16.gmra.mxu1 %vm1108_vm0, %v2920_v57 }
  0xad   :  { %2691 = vmatprep.mubr.msk.bf16.mxu1 %vm1108_vm0, %v2927_v58  ;;  %2720 = vmatpush3.bf16.msra.mxu1 %v2974_v23 }
  0xae   :  { %2721 = vmatprep.subr.bf16.mxu1 %v2975_v30 }
  0xb1   :  { %2722 = vmatpush3.bf16.msra.mxu1 %v2975_v30 }
  0xb2   :  { %1528 = vmatmul.mubr.bf16.gmra.mxu0 %v2918_v59  ;;  %2723 = vmatprep.subr.bf16.mxu1 %v2976_v40 }
  0xb3   :  { %1535 = vmatprep.mubr.bf16.mxu0 %v2921_v60  ;;  %v2978_v60 = vld [vmem:[%s3801_s3 + $0x8] sm:$0xff]  }
  0xb4   :  { %2692 = vmatmul.mubr.msk.bf16.gmra.mxu1 %vm1108_vm0, %v2928_v61 }
  0xb5   :  { %2695 = vmatprep.mubr.msk.bf16.mxu1 %vm1108_vm0, %v2935_v62  ;;  %2724 = vmatpush3.bf16.msra.mxu1 %v2976_v40 }
  0xb6   :  { %2725 = vmatprep.subr.bf16.mxu1 %v2977_v50 }
  0xb9   :  { %2726 = vmatpush3.bf16.msra.mxu1 %v2977_v50 }
  0xba   :  { %1536 = vmatmul.mubr.bf16.gmra.mxu0 %v2923_v63  ;;  %2727 = vmatprep.subr.bf16.mxu1 %v2978_v60 }
  0xbb   :  { %1543 = vmatprep.mubr.bf16.mxu0 %v2924_v0 }
  0xbc   :  { %2696 = vmatmul.mubr.msk.bf16.gmra.mxu1 %vm1108_vm0, %v2936_v1 }
  0xbd   :  { %2699 = vmatprep.mubr.msk.bf16.mxu1 %vm1108_vm0, %v2943_v2  ;;  %2728 = vmatpush3.bf16.msra.mxu1 %v2978_v60 }
  0xc2   :  { %1544 = vmatmul.mubr.bf16.gmra.mxu0 %v2926_v3 }
  0xc3   :  { %1551 = vmatprep.mubr.bf16.mxu0 %v2929_v4 }
  0xc4   :  { %2700 = vmatmul.mubr.msk.bf16.gmra.mxu1 %vm1108_vm0, %v2944_v5  ;;  %v2955_v5 = vld [vmem:[%s3800_s0 + $0x278] ss:$28 sps:$4 sm:$0xff]  }
  0xc5   :  { %2703 = vmatprep.mubr.msk.bf16.mxu1 %vm1108_vm0, %v2951_v6  ;;  %v2979_v6 = vld [vmem:[%s3801_s3] sm:$0xff]  }
  0xc6   :  { %2729 = vmatprep.subr.bf16.mxu1 %v2979_v6 }
  0xc7   :  { %2730 = vmatpush3.bf16.msra.mxu1 %v2979_v6 }
  0xca   :  { %1552 = vmatmul.mubr.bf16.gmra.mxu0 %v2931_v7 }
  0xcb   :  { %1559 = vmatprep.mubr.bf16.mxu0 %v2932_v8 }
  0xcc   :  { %2704 = vmatmul.mubr.msk.bf16.gmra.mxu1 %vm1108_vm0, %v2952_v9  ;;  %v2958_v9 = vld [vmem:[%s3800_s0 + $0x2b4] ss:$28 sps:$4 sm:$0xff]  }
  0xcd   :  { %2707 = vmatprep.mubr.msk.bf16.mxu1 %vm1108_vm0, %v2959_v10 }
  0xd2   :  { %1560 = vmatmul.mubr.bf16.gmra.mxu0 %v2934_v11 }
  0xd3   :  { %1567 = vmatprep.mubr.bf16.mxu0 %v2937_v12 }
  0xd4   :  { %2708 = vmatmul.mubr.msk.bf16.gmra.mxu1 %vm1108_vm0, %v2960_v13 }
  0xd5   :  { %2711 = vmatprep.mubr.msk.bf16.mxu1 %vm1108_vm0, %v2967_v14 }
  0xda   :  { %1568 = vmatmul.mubr.bf16.gmra.mxu0 %v2939_v15 }
  0xdb   :  { %1575 = vmatprep.mubr.bf16.mxu0 %v2940_v16 }
  0xdc   :  { %2712 = vmatmul.mubr.msk.bf16.gmra.mxu1 %vm1108_vm0, %v2968_v17 }
  0xe2   :  { %v2320_v22 = vpop.f32.mrf.mxu0  ;;  %1576 = vmatmul.mubr.bf16.gmra.mxu0 %v2942_v19 }
  0xe3   :  { %1583 = vmatprep.mubr.bf16.mxu0 %v2945_v20 }
  0xe4   :  { %v2321_v25 = vpop.f32.mrf.mxu0  ;;  %v2432_v27 = vpop.f32.mrf.mxu1 }
  0xe5   :  { %v2322_v26 = vadd.f32 %v2321_v25, %v2320_v22  ;;  %v2956_v25 = vld [vmem:[%s3800_s0 + $0x2b0] ss:$28 sps:$4 sm:$0xff]  }
  0xe6   :  { %v2323_v28 = vpop.f32.mrf.mxu0  ;;  %v2433_v32 = vpop.f32.mrf.mxu1 }
  0xe7   :  { %v1192_v31 = vadd.f32 %v2322_v26, %v3482_v24  ;;  %v2434_v34 = vadd.f32 %v2433_v32, %v2432_v27 }
  0xe8   :  { %v2324_v35 = vpop.f32.mrf.mxu0  ;;  %v2435_v37 = vpop.f32.mrf.mxu1 }
  0xe9   :  { %v2325_v36 = vadd.f32 %v2324_v35, %v2323_v28  ;;  %v3494_v38 = vadd.f32 %v2434_v34, %v1192_v31  ;;  %v2963_v28 = vld [vmem:[%s3800_s0 + $0x2ec] ss:$28 sps:$4 sm:$0xff]  }
  0xea   :  { %v2326_v39 = vpop.f32.mrf.mxu0  ;;  %1584 = vmatmul.mubr.bf16.gmra.mxu0 %v2947_v29  ;;  %v2436_v42 = vpop.f32.mrf.mxu1 }
  0xeb   :  { %v1195_v41 = vadd.f32 %v2325_v36, %v3482_v24  ;;  %1591 = vmatprep.mubr.bf16.mxu0 %v2948_v33  ;;  %v2437_v43 = vadd.f32 %v2436_v42, %v2435_v37 }
  0xec   :  { %v2327_v44 = vpop.f32.mrf.mxu0  ;;  %v2438_v46 = vpop.f32.mrf.mxu1 }
  0xed   :  { %v2328_v45 = vadd.f32 %v2327_v44, %v2326_v39  ;;  %v3500_v47 = vadd.f32 %v2437_v43, %v1195_v41  ;;  %v2961_v44 = vld [vmem:[%s3800_s0 + $0x2e8] ss:$28 sps:$4 sm:$0xff]  }
  0xee   :  { %v2329_v48 = vpop.f32.mrf.mxu0  ;;  %v2439_v52 = vpop.f32.mrf.mxu1 }
  0xef   :  { %v1200_v51 = vadd.f32 %v2328_v45, %v3482_v24  ;;  %v2440_v54 = vadd.f32 %v2439_v52, %v2438_v46 }
  0xf0   :  { %v2330_v55 = vpop.f32.mrf.mxu0  ;;  %v2441_v57 = vpop.f32.mrf.mxu1 }
  0xf1   :  { %v2331_v56 = vadd.f32 %v2330_v55, %v2329_v48  ;;  %v3512_v58 = vadd.f32 %v2440_v54, %v1200_v51  ;;  %v2966_v48 = vld [vmem:[%s3800_s0 + $0x324] ss:$28 sps:$4 sm:$0xff]  }
  0xf2   :  { %v2332_v59 = vpop.f32.mrf.mxu0  ;;  %1592 = vmatmul.mubr.bf16.gmra.mxu0 %v2950_v49  ;;  %v2442_v62 = vpop.f32.mrf.mxu1 }
  0xf3   :  { %v1203_v61 = vadd.f32 %v2331_v56, %v3482_v24  ;;  %1599 = vmatprep.mubr.bf16.mxu0 %v2953_v53  ;;  %v2443_v63 = vadd.f32 %v2442_v62, %v2441_v57 }
  0xf4   :  { %v2333_v0 = vpop.f32.mrf.mxu0  ;;  %v2444_v2 = vpop.f32.mrf.mxu1 }
  0xf5   :  { %v2334_v1 = vadd.f32 %v2333_v0, %v2332_v59  ;;  %v3518_v3 = vadd.f32 %v2443_v63, %v1203_v61  ;;  %v2964_v0 = vld [vmem:[%s3800_s0 + $0x320] ss:$28 sps:$4 sm:$0xff]  }
  0xf6   :  { %v2335_v4 = vpop.f32.mrf.mxu0  ;;  %v2445_v8 = vpop.f32.mrf.mxu1 }
  0xf7   :  { %v1208_v7 = vadd.f32 %v2334_v1, %v3482_v24  ;;  %v2446_v10 = vadd.f32 %v2445_v8, %v2444_v2 }
  0xf8   :  { %v2336_v11 = vpop.f32.mrf.mxu0  ;;  %v2447_v13 = vpop.f32.mrf.mxu1 }
  0xf9   :  { %v2337_v12 = vadd.f32 %v2336_v11, %v2335_v4  ;;  %v3530_v14 = vadd.f32 %v2446_v10, %v1208_v7  ;;  %v2971_v4 = vld [vmem:[%s3800_s0 + $0x35c] ss:$28 sps:$4 sm:$0xff]  }
  0xfa   :  { %v2338_v15 = vpop.f32.mrf.mxu0  ;;  %1600 = vmatmul.mubr.bf16.gmra.mxu0 %v2955_v5  ;;  %v2448_v17 = vpop.f32.mrf.mxu1 }
  0xfb   :  { %v1211_v16 = vadd.f32 %v2337_v12, %v3482_v24  ;;  %1607 = vmatprep.mubr.bf16.mxu0 %v2958_v9  ;;  %v2449_v18 = vadd.f32 %v2448_v17, %v2447_v13 }
  0xfc   :  { %v2339_v19 = vpop.f32.mrf.mxu0  ;;  %v2450_v21 = vpop.f32.mrf.mxu1 }
  0xfd   :  { %v2340_v20 = vadd.f32 %v2339_v19, %v2338_v15  ;;  %v3533_v22 = vadd.f32 %v2449_v18, %v1211_v16 }
  0xfe   :  { %v2341_v23 = vpop.f32.mrf.mxu0  ;;  %v2451_v27 = vpop.f32.mrf.mxu1 }
  0xff   :  { %v1216_v26 = vadd.f32 %v2340_v20, %v3482_v24  ;;  %v2452_v29 = vadd.f32 %v2451_v27, %v2450_v21  ;;  %v2969_v20 = vld [vmem:[%s3800_s0 + $0x358] ss:$28 sps:$4 sm:$0xff]  }
 0x100   :  { %v2342_v30 = vpop.f32.mrf.mxu0  ;;  %v2453_v32 = vpop.f32.mrf.mxu1 }
 0x101   :  { %v2343_v31 = vadd.f32 %v2342_v30, %v2341_v23  ;;  %v3542_v33 = vadd.f32 %v2452_v29, %v1216_v26 }
 0x102   :  { %v2344_v34 = vpop.f32.mrf.mxu0  ;;  %1608 = vmatmul.mubr.bf16.gmra.mxu0 %v2956_v25  ;;  %v2454_v36 = vpop.f32.mrf.mxu1 }
 0x103   :  { %v1219_v35 = vadd.f32 %v2343_v31, %v3482_v24  ;;  %1615 = vmatprep.mubr.bf16.mxu0 %v2963_v28  ;;  %v2455_v37 = vadd.f32 %v2454_v36, %v2453_v32 }
 0x104   :  { %v2345_v39 = vpop.f32.mrf.mxu0  ;;  %v2456_v41 = vpop.f32.mrf.mxu1 }
 0x105   :  { %v2346_v40 = vadd.f32 %v2345_v39, %v2344_v34  ;;  %v3545_v42 = vadd.f32 %v2455_v37, %v1219_v35 }
 0x106   :  { %v2347_v43 = vpop.f32.mrf.mxu0  ;;  %v2457_v46 = vpop.f32.mrf.mxu1 }
 0x107   :  { %v1224_v45 = vadd.f32 %v2346_v40, %v3482_v24  ;;  %v2458_v49 = vadd.f32 %v2457_v46, %v2456_v41 }
 0x108   :  { %v2348_v50 = vpop.f32.mrf.mxu0  ;;  %v2459_v52 = vpop.f32.mrf.mxu1 }
 0x109   :  { %v2349_v51 = vadd.f32 %v2348_v50, %v2347_v43  ;;  %v3554_v53 = vadd.f32 %v2458_v49, %v1224_v45 }
 0x10a   :  { %v2350_v54 = vpop.f32.mrf.mxu0  ;;  %1616 = vmatmul.mubr.bf16.gmra.mxu0 %v2961_v44  ;;  %v2460_v56 = vpop.f32.mrf.mxu1 }
 0x10b   :  { %v1227_v55 = vadd.f32 %v2349_v51, %v3482_v24  ;;  %1623 = vmatprep.mubr.bf16.mxu0 %v2966_v48  ;;  %v2461_v57 = vadd.f32 %v2460_v56, %v2459_v52 }
 0x10c   :  { %v2351_v59 = vpop.f32.mrf.mxu0  ;;  %v2462_v61 = vpop.f32.mrf.mxu1 }
 0x10d   :  { %v2352_v60 = vadd.f32 %v2351_v59, %v2350_v54  ;;  %v3557_v62 = vadd.f32 %v2461_v57, %v1227_v55 }
 0x10e   :  { %v2353_v63 = vpop.f32.mrf.mxu0  ;;  %v2463_v2 = vpop.f32.mrf.mxu1 }
 0x10f   :  { %v1232_v1 = vadd.f32 %v2352_v60, %v3482_v24  ;;  %v2464_v5 = vadd.f32 %v2463_v2, %v2462_v61 }
 0x110   :  { %v2354_v6 = vpop.f32.mrf.mxu0  ;;  %v2465_v8 = vpop.f32.mrf.mxu1 }
 0x111   :  { %v2355_v7 = vadd.f32 %v2354_v6, %v2353_v63  ;;  %v3566_v9 = vadd.f32 %v2464_v5, %v1232_v1 }
 0x112   :  { %v2356_v10 = vpop.f32.mrf.mxu0  ;;  %1624 = vmatmul.mubr.bf16.gmra.mxu0 %v2964_v0  ;;  %v2466_v12 = vpop.f32.mrf.mxu1 }
 0x113   :  { %v1235_v11 = vadd.f32 %v2355_v7, %v3482_v24  ;;  %1631 = vmatprep.mubr.bf16.mxu0 %v2971_v4  ;;  %v2467_v13 = vadd.f32 %v2466_v12, %v2465_v8 }
 0x114   :  { %v2357_v15 = vpop.f32.mrf.mxu0  ;;  %v2468_v17 = vpop.f32.mrf.mxu1 }
 0x115   :  { %v2358_v16 = vadd.f32 %v2357_v15, %v2356_v10  ;;  %v3569_v18 = vadd.f32 %v2467_v13, %v1235_v11 }
 0x116   :  { %v2359_v19 = vpop.f32.mrf.mxu0  ;;  %v2469_v23 = vpop.f32.mrf.mxu1 }
 0x117   :  { %v1240_v21 = vadd.f32 %v2358_v16, %v3482_v24  ;;  %v2470_v25 = vadd.f32 %v2469_v23, %v2468_v17 }
 0x118   :  { %v2360_v26 = vpop.f32.mrf.mxu0  ;;  %v2471_v28 = vpop.f32.mrf.mxu1 }
 0x119   :  { %v2361_v27 = vadd.f32 %v2360_v26, %v2359_v19  ;;  %v3575_v29 = vadd.f32 %v2470_v25, %v1240_v21 }
 0x11a   :  { %v2362_v30 = vpop.f32.mrf.mxu0  ;;  %1632 = vmatmul.mubr.bf16.gmra.mxu0 %v2969_v20  ;;  %v2472_v32 = vpop.f32.mrf.mxu1 }
 0x11b   :  { %v1243_v31 = vadd.f32 %v2361_v27, %v3482_v24  ;;  %v2473_v34 = vadd.f32 %v2472_v32, %v2471_v28 }
 0x11c   :  { %v2363_v35 = vpop.f32.mrf.mxu0  ;;  %v2474_v37 = vpop.f32.mrf.mxu1 }
 0x11d   :  { %v2364_v36 = vadd.f32 %v2363_v35, %v2362_v30  ;;  %v3578_v39 = vadd.f32 %v2473_v34, %v1243_v31 }
 0x11e   :  { %v2365_v40 = vpop.f32.mrf.mxu0  ;;  %v2475_v43 = vpop.f32.mrf.mxu1 }
 0x11f   :  { %v1248_v41 = vadd.f32 %v2364_v36, %v3482_v24  ;;  %v2476_v44 = vadd.f32 %v2475_v43, %v2474_v37 }
 0x120   :  { %v2366_v45 = vpop.f32.mrf.mxu0  ;;  %v2477_v48 = vpop.f32.mrf.mxu1 }
 0x121   :  { %v2367_v46 = vadd.f32 %v2366_v45, %v2365_v40  ;;  %v3581_v49 = vadd.f32 %v2476_v44, %v1248_v41 }
 0x122   :  { %v2368_v50 = vpop.f32.mrf.mxu0  ;;  %v2478_v52 = vpop.f32.mrf.mxu1 }
 0x123   :  { %v1251_v51 = vadd.f32 %v2367_v46, %v3482_v24  ;;  %v2479_v54 = vadd.f32 %v2478_v52, %v2477_v48 }
 0x124   :  { %v2369_v55 = vpop.f32.mrf.mxu0  ;;  %v2480_v57 = vpop.f32.mrf.mxu1 }
 0x125   :  { %v2370_v56 = vadd.f32 %v2369_v55, %v2368_v50  ;;  %v3584_v59 = vadd.f32 %v2479_v54, %v1251_v51 }
 0x126   :  { %v2371_v60 = vpop.f32.mrf.mxu0  ;;  %v2481_v63 = vpop.f32.mrf.mxu1 }
 0x127   :  { %v1256_v61 = vadd.f32 %v2370_v56, %v3482_v24  ;;  %v2482_v0 = vadd.f32 %v2481_v63, %v2480_v57 }
 0x128   :  { %v2372_v1 = vpop.f32.mrf.mxu0  ;;  %v2483_v4 = vpop.f32.mrf.mxu1 }
 0x129   :  { %v2373_v2 = vadd.f32 %v2372_v1, %v2371_v60  ;;  %v3587_v5 = vadd.f32 %v2482_v0, %v1256_v61 }
 0x12a   :  { %v2374_v6 = vpop.f32.mrf.mxu0  ;;  %v2484_v8 = vpop.f32.mrf.mxu1 }
 0x12b   :  { %v1259_v7 = vadd.f32 %v2373_v2, %v3482_v24  ;;  %v2485_v10 = vadd.f32 %v2484_v8, %v2483_v4 }
 0x12c   :  { %v2375_v11 = vpop.f32.mrf.mxu0  ;;  %v2486_v13 = vpop.f32.mrf.mxu1 }
 0x12d   :  { %v2376_v12 = vadd.f32 %v2375_v11, %v2374_v6  ;;  %v3590_v15 = vadd.f32 %v2485_v10, %v1259_v7 }
 0x12e   :  { %v2377_v16 = vpop.f32.mrf.mxu0  ;;  %v2487_v19 = vpop.f32.mrf.mxu1 }
 0x12f   :  { %v1264_v17 = vadd.f32 %v2376_v12, %v3482_v24  ;;  %v2488_v20 = vadd.f32 %v2487_v19, %v2486_v13 }
 0x130   :  { %v2378_v21 = vpop.f32.mrf.mxu0  ;;  %v2489_v25 = vpop.f32.mrf.mxu1 }
 0x131   :  { %v2379_v23 = vadd.f32 %v2378_v21, %v2377_v16  ;;  %v3593_v26 = vadd.f32 %v2488_v20, %v1264_v17 }
 0x132   :  { %v2380_v27 = vpop.f32.mrf.mxu0  ;;  %v2490_v30 = vpop.f32.mrf.mxu1 }
 0x133   :  { %v1267_v28 = vadd.f32 %v2379_v23, %v3482_v24  ;;  %v2491_v31 = vadd.f32 %v2490_v30, %v2489_v25 }
 0x134   :  { %v2381_v32 = vpop.f32.mrf.mxu0  ;;  %v2492_v35 = vpop.f32.mrf.mxu1 }
 0x135   :  { %v2382_v34 = vadd.f32 %v2381_v32, %v2380_v27  ;;  %v3596_v36 = vadd.f32 %v2491_v31, %v1267_v28 }
 0x136   :  { %v2383_v37 = vpop.f32.mrf.mxu0  ;;  %v2493_v41 = vpop.f32.mrf.mxu1 }
 0x137   :  { %v1272_v40 = vadd.f32 %v2382_v34, %v3482_v24  ;;  %v2494_v43 = vadd.f32 %v2493_v41, %v2492_v35 }
 0x138   :  { %v2384_v44 = vpop.f32.mrf.mxu0  ;;  %v2495_v46 = vpop.f32.mrf.mxu1 }
 0x139   :  { %v2385_v45 = vadd.f32 %v2384_v44, %v2383_v37  ;;  %v3599_v48 = vadd.f32 %v2494_v43, %v1272_v40 }
 0x13a   :  { %v2386_v50 = vpop.f32.mrf.mxu0  ;;  %v2496_v52 = vpop.f32.mrf.mxu1 }
 0x13b   :  { %v1275_v51 = vadd.f32 %v2385_v45, %v3482_v24  ;;  %v2497_v54 = vadd.f32 %v2496_v52, %v2495_v46 }
 0x13c   :  { %v2387_v55 = vpop.f32.mrf.mxu0  ;;  %v2498_v57 = vpop.f32.mrf.mxu1 }
 0x13d   :  { %v2388_v56 = vadd.f32 %v2387_v55, %v2386_v50  ;;  %v3602_v60 = vadd.f32 %v2497_v54, %v1275_v51 }
 0x13e   :  { %v2389_v61 = vpop.f32.mrf.mxu0  ;;  %v2499_v0 = vpop.f32.mrf.mxu1 }
 0x13f   :  { %v1280_v63 = vadd.f32 %v2388_v56, %v3482_v24  ;;  %v2500_v1 = vadd.f32 %v2499_v0, %v2498_v57 }
 0x140   :  { %v2390_v2 = vpop.f32.mrf.mxu0  ;;  %v2501_v6 = vpop.f32.mrf.mxu1 }
 0x141   :  { %v2391_v4 = vadd.f32 %v2390_v2, %v2389_v61  ;;  %v3605_v7 = vadd.f32 %v2500_v1, %v1280_v63 }
 0x142   :  { %v2392_v8 = vpop.f32.mrf.mxu0  ;;  %v2502_v11 = vpop.f32.mrf.mxu1 }
 0x143   :  { %v1283_v10 = vadd.f32 %v2391_v4, %v3482_v24  ;;  %v2503_v12 = vadd.f32 %v2502_v11, %v2501_v6 }
 0x144   :  { %v2393_v13 = vpop.f32.mrf.mxu0  ;;  %v2504_v17 = vpop.f32.mrf.mxu1 }
 0x145   :  { %v2394_v16 = vadd.f32 %v2393_v13, %v2392_v8  ;;  %v3608_v19 = vadd.f32 %v2503_v12, %v1283_v10 }
 0x146   :  { %v2395_v20 = vpop.f32.mrf.mxu0  ;;  %v2505_v23 = vpop.f32.mrf.mxu1 }
 0x147   :  { %v1288_v21 = vadd.f32 %v2394_v16, %v3482_v24  ;;  %v2506_v25 = vadd.f32 %v2505_v23, %v2504_v17 }
 0x148   :  { %v2396_v27 = vpop.f32.mrf.mxu0  ;;  %v2507_v30 = vpop.f32.mrf.mxu1 }
 0x149   :  { %v2397_v28 = vadd.f32 %v2396_v27, %v2395_v20  ;;  %v3611_v31 = vadd.f32 %v2506_v25, %v1288_v21 }
 0x14a   :  { %v2398_v32 = vpop.f32.mrf.mxu0  ;;  %v2508_v35 = vpop.f32.mrf.mxu1 }
 0x14b   :  { %v1291_v34 = vadd.f32 %v2397_v28, %v3482_v24  ;;  %v2509_v37 = vadd.f32 %v2508_v35, %v2507_v30 }
 0x14c   :  { %v2399_v40 = vpop.f32.mrf.mxu0  ;;  %v2510_v43 = vpop.f32.mrf.mxu1 }
 0x14d   :  { %v2400_v41 = vadd.f32 %v2399_v40, %v2398_v32  ;;  %v3614_v44 = vadd.f32 %v2509_v37, %v1291_v34 }
 0x14e   :  { %v2401_v45 = vpop.f32.mrf.mxu0  ;;  %v2511_v50 = vpop.f32.mrf.mxu1 }
 0x14f   :  { %v1296_v46 = vadd.f32 %v2400_v41, %v3482_v24  ;;  %v2512_v51 = vadd.f32 %v2511_v50, %v2510_v43 }
 0x150   :  { %v2402_v52 = vpop.f32.mrf.mxu0  ;;  %v2513_v55 = vpop.f32.mrf.mxu1 }
 0x151   :  { %v2403_v54 = vadd.f32 %v2402_v52, %v2401_v45  ;;  %v3617_v56 = vadd.f32 %v2512_v51, %v1296_v46 }
 0x152   :  { %v2404_v57 = vpop.f32.mrf.mxu0  ;;  %v2514_v63 = vpop.f32.mrf.mxu1 }
 0x153   :  { %v1299_v61 = vadd.f32 %v2403_v54, %v3482_v24  ;;  %v2515_v0 = vadd.f32 %v2514_v63, %v2513_v55 }
 0x154   :  { %v2405_v1 = vpop.f32.mrf.mxu0  ;;  %v2516_v4 = vpop.f32.mrf.mxu1 }
 0x155   :  { %v2406_v2 = vadd.f32 %v2405_v1, %v2404_v57  ;;  %v3620_v6 = vadd.f32 %v2515_v0, %v1299_v61 }
 0x156   :  { %v2407_v8 = vpop.f32.mrf.mxu0  ;;  %v2517_v11 = vpop.f32.mrf.mxu1 }
 0x157   :  { %v1304_v10 = vadd.f32 %v2406_v2, %v3482_v24  ;;  %v2518_v12 = vadd.f32 %v2517_v11, %v2516_v4 }
 0x158   :  { %v2408_v13 = vpop.f32.mrf.mxu0  ;;  %v2519_v17 = vpop.f32.mrf.mxu1 }
 0x159   :  { %v2409_v16 = vadd.f32 %v2408_v13, %v2407_v8  ;;  %v3623_v20 = vadd.f32 %v2518_v12, %v1304_v10 }
 0x15a   :  { %v2410_v21 = vpop.f32.mrf.mxu0  ;;  %v2520_v25 = vpop.f32.mrf.mxu1 }
 0x15b   :  { %v1307_v23 = vadd.f32 %v2409_v16, %v3482_v24  ;;  %v2521_v27 = vadd.f32 %v2520_v25, %v2519_v17 }
 0x15c   :  { %v2411_v28 = vpop.f32.mrf.mxu0  ;;  %v2522_v32 = vpop.f32.mrf.mxu1 }
 0x15d   :  { %v2412_v30 = vadd.f32 %v2411_v28, %v2410_v21  ;;  %v3626_v34 = vadd.f32 %v2521_v27, %v1307_v23 }
 0x15e   :  { %v2413_v35 = vpop.f32.mrf.mxu0  ;;  %v2523_v40 = vpop.f32.mrf.mxu1 }
 0x15f   :  { %v1312_v37 = vadd.f32 %v2412_v30, %v3482_v24  ;;  %v2524_v41 = vadd.f32 %v2523_v40, %v2522_v32 }
 0x160   :  { %v2414_v43 = vpop.f32.mrf.mxu0  ;;  %v2525_v46 = vpop.f32.mrf.mxu1 }
 0x161   :  { %v2415_v45 = vadd.f32 %v2414_v43, %v2413_v35  ;;  %v3629_v50 = vadd.f32 %v2524_v41, %v1312_v37 }
 0x162   :  { %v2544_v51 = vpop.f32.mrf.mxu0  ;;  %v2526_v54 = vpop.f32.mrf.mxu1 }
 0x163   :  { %v1315_v52 = vadd.f32 %v2415_v45, %v3482_v24  ;;  %v2527_v55 = vadd.f32 %v2526_v54, %v2525_v46 }
 0x164   :  { %v2545_v57 = vpop.f32.mrf.mxu0  ;;  %v2685_v63 = vpop.f32.mrf.mxu1 }
 0x165   :  { %v2546_v61 = vadd.f32 %v2545_v57, %v2544_v51  ;;  %v3632_v0 = vadd.f32 %v2527_v55, %v1315_v52 }
 0x166   :  { %v2547_v1 = vpop.f32.mrf.mxu0  ;;  %v1674_v4 = vpop.f32.mrf.mxu1 }
 0x167   :  { %v1514_v2 = vadd.f32 %v2546_v61, %v3494_v38 }
 0x168   :  { %v2548_v8 = vpop.f32.mrf.mxu0  ;;  %v2686_v11 = vpop.f32.mrf.mxu1 }
 0x169   :  { %v2549_v10 = vadd.f32 %v2548_v8, %v2547_v1  ;;  %v1675_v13 = vadd.f32 %v1674_v4, %v1514_v2 }
 0x16a   :  { %v2550_v12 = vpop.f32.mrf.mxu0  ;;  %v1677_v17 = vpop.f32.mrf.mxu1 }
 0x16b   :  { %v1517_v16 = vadd.f32 %v2549_v10, %v3500_v47  ;;  %v1801_v28 = vmax.f32 %v1675_v13, 0.0 }
 0x16c   :  { %v2551_v24 = vpop.f32.mrf.mxu0  ;;  %v2689_v27 = vpop.f32.mrf.mxu1 }
 0x16d   :  { %v2552_v21 = vadd.f32 %v2551_v24, %v2550_v12  ;;  %v1678_v23 = vadd.f32 %v1677_v17, %v1517_v16 }
 0x16e   :  { %v2553_v25 = vpop.f32.mrf.mxu0  ;;  %v1690_v41 = vpop.f32.mrf.mxu1 }
 0x16f   :  { %v1522_v30 = vadd.f32 %v2552_v21, %v3512_v58  ;;  %v1802_v32 = vmax.f32 %v1678_v23, 0.0 }
 0x170   :  { %v2554_v35 = vpop.f32.mrf.mxu0  ;;  %v2690_v54 = vpop.f32.mrf.mxu1 }
 0x171   :  { %v1833_v38 = vpack.c.bf16 %v1802_v32, %v1801_v28  ;;  %v2555_v37 = vadd.f32 %v2554_v35, %v2553_v25  ;;  %v1683_v43 = vadd.f32 %v2685_v63, %v1522_v30 }
 0x172   :  { %v2556_v40 = vpop.f32.mrf.mxu0  ;;  %v1693_v8 = vpop.f32.mrf.mxu1 }
 0x173   :  { %v1525_v45 = vadd.f32 %v2555_v37, %v3518_v3  ;;  %2731 = vmatprep.mubr.bf16.mxu1 %v1833_v38  ;;  %v1803_v55 = vmax.f32 %v1683_v43, 0.0 }
 0x174   :  { %v2557_v47 = vpop.f32.mrf.mxu0  ;;  %v2693_v16 = vpop.f32.mrf.mxu1 }
 0x175   :  { %v1686_v46 = vadd.f32 %v2686_v11, %v1525_v45  ;;  %v2558_v51 = vadd.f32 %v2557_v47, %v2556_v40 }
 0x176   :  { %v2559_v52 = vpop.f32.mrf.mxu0  ;;  %v1706_v30 = vpop.f32.mrf.mxu1 }
 0x177   :  { %v1804_v57 = vmax.f32 %v1686_v46, 0.0  ;;  %v1530_v61 = vadd.f32 %v2558_v51, %v3530_v14 }
 0x178   :  { %v2560_v58 = vpop.f32.mrf.mxu0 }
 0x179   :  { %v1834_v1 = vpack.c.bf16 %v1804_v57, %v1803_v55  ;;  %v2561_v2 = vadd.f32 %v2560_v58, %v2559_v52  ;;  %v1691_v10 = vadd.f32 %v1690_v41, %v1530_v61  ;;  %v2694_v41 = vpop.f32.mrf.mxu1 }
 0x17a   :  { %v2562_v4 = vpop.f32.mrf.mxu0 }
 0x17b   :  { %2732 = vmatmul.mubr.bf16.vlgmr.msra.gmra.mxu1 %v1834_v1  ;;  %v1533_v63 = vadd.f32 %v2561_v2, %v3533_v22  ;;  %v1805_v17 = vmax.f32 %v1691_v10, 0.0  ;;  %v1709_v55 = vpop.f32.mrf.mxu1 }
 0x17c   :  { %v2563_v3 = vpop.f32.mrf.mxu0 }
 0x17d   :  { %v2564_v12 = vadd.f32 %v2563_v3, %v2562_v4  ;;  %v1694_v13 = vadd.f32 %v1693_v8, %v1533_v63  ;;  %v2697_v1 = vpop.f32.mrf.mxu1 }
 0x17e   :  { %v2565_v11 = vpop.f32.mrf.mxu0 }
 0x17f   :  { %v1538_v24 = vadd.f32 %v2564_v12, %v3542_v33  ;;  %v1806_v21 = vmax.f32 %v1694_v13, 0.0  ;;  %v1722_v12 = vpop.f32.mrf.mxu1 }
 0x180   :  { %v2566_v23 = vpop.f32.mrf.mxu0 }
 0x181   :  { %v1835_v14 = vpack.c.bf16 %v1806_v21, %v1805_v17  ;;  %v2567_v25 = vadd.f32 %v2566_v23, %v2565_v11  ;;  %v1699_v32 = vadd.f32 %v2689_v27, %v1538_v24  ;;  %v2698_v23 = vpop.f32.mrf.mxu1 }
 0x182   :  { %v2568_v28 = vpop.f32.mrf.mxu0 }
 0x183   :  { %v1541_v35 = vadd.f32 %v2567_v25, %v3545_v42  ;;  %2735 = vmatprep.mubr.bf16.mxu1 %v1835_v14  ;;  %v1807_v43 = vmax.f32 %v1699_v32, 0.0 }
 0x184   :  { %v2569_v38 = vpop.f32.mrf.mxu0 }
 0x185   :  { %v1702_v22 = vadd.f32 %v2690_v54, %v1541_v35  ;;  %v2570_v37 = vadd.f32 %v2569_v38, %v2568_v28  ;;  %v1725_v38 = vpop.f32.mrf.mxu1 }
 0x186   :  { %v2571_v40 = vpop.f32.mrf.mxu0 }
 0x187   :  { %v1808_v45 = vmax.f32 %v1702_v22, 0.0  ;;  %v1546_v47 = vadd.f32 %v2570_v37, %v3554_v53 }
 0x188   :  { %v2572_v33 = vpop.f32.mrf.mxu0 }
 0x189   :  { %v2573_v46 = vadd.f32 %v2572_v33, %v2571_v40  ;;  %v1836_v51 = vpack.c.bf16 %v1808_v45, %v1807_v43  ;;  %v1707_v57 = vadd.f32 %v1706_v30, %v1546_v47  ;;  %v2701_v43 = vpop.f32.mrf.mxu1 }
 0x18a   :  { %v2574_v52 = vpop.f32.mrf.mxu0 }
 0x18b   :  { %2736 = vmatmul.mubr.bf16.gmra.mxu1 %v1836_v51  ;;  %v1549_v27 = vadd.f32 %v2573_v46, %v3557_v62  ;;  %v1809_v2 = vmax.f32 %v1707_v57, 0.0 }
 0x18c   :  { %v2575_v42 = vpop.f32.mrf.mxu0 }
 0x18d   :  { %v2576_v61 = vadd.f32 %v2575_v42, %v2574_v52  ;;  %v1710_v58 = vadd.f32 %v1709_v55, %v1549_v27  ;;  %v1738_v55 = vpop.f32.mrf.mxu1 }
 0x18e   :  { %v2577_v54 = vpop.f32.mrf.mxu0 }
 0x18f   :  { %v1554_v4 = vadd.f32 %v2576_v61, %v3566_v9  ;;  %v1810_v8 = vmax.f32 %v1710_v58, 0.0 }
 0x190   :  { %v2578_v10 = vpop.f32.mrf.mxu0 }
 0x191   :  { %v1837_v53 = vpack.c.bf16 %v1810_v8, %v1809_v2  ;;  %v2579_v63 = vadd.f32 %v2578_v10, %v2577_v54  ;;  %v1715_v13 = vadd.f32 %v2693_v16, %v1554_v4  ;;  %v2702_v54 = vpop.f32.mrf.mxu1 }
 0x192   :  { %v2580_v3 = vpop.f32.mrf.mxu0 }
 0x193   :  { %v1557_v11 = vadd.f32 %v2579_v63, %v3569_v18  ;;  %2739 = vmatprep.mubr.bf16.mxu1 %v1837_v53  ;;  %v1811_v14 = vmax.f32 %v1715_v13, 0.0 }
 0x194   :  { %v2581_v17 = vpop.f32.mrf.mxu0 }
 0x195   :  { %v1718_v62 = vadd.f32 %v2694_v41, %v1557_v11  ;;  %v2582_v24 = vadd.f32 %v2581_v17, %v2580_v3  ;;  %v1741_v3 = vpop.f32.mrf.mxu1 }
 0x196   :  { %v2583_v21 = vpop.f32.mrf.mxu0 }
 0x197   :  { %v1812_v25 = vmax.f32 %v1718_v62, 0.0  ;;  %v1562_v28 = vadd.f32 %v2582_v24, %v3575_v29  ;;  %v2705_v62 = vpop.f32.mrf.mxu1 }
 0x198   :  { %v2584_v9 = vpop.f32.mrf.mxu0 }
 0x199   :  { %v2585_v30 = vadd.f32 %v2584_v9, %v2583_v21  ;;  %v1838_v32 = vpack.c.bf16 %v1812_v25, %v1811_v14  ;;  %v1723_v22 = vadd.f32 %v1722_v12, %v1562_v28  ;;  %v1754_v9 = vpop.f32.mrf.mxu1 }
 0x19a   :  { %v2586_v35 = vpop.f32.mrf.mxu0 }
 0x19b   :  { %2740 = vmatmul.mubr.bf16.gmra.mxu1 %v1838_v32  ;;  %v1565_v16 = vadd.f32 %v2585_v30, %v3578_v39  ;;  %v1813_v45 = vmax.f32 %v1723_v22, 0.0 }
 0x19c   :  { %v2587_v18 = vpop.f32.mrf.mxu0 }
 0x19d   :  { %v2588_v37 = vadd.f32 %v2587_v18, %v2586_v35  ;;  %v1726_v40 = vadd.f32 %v1725_v38, %v1565_v16  ;;  %v2706_v16 = vpop.f32.mrf.mxu1 }
 0x19e   :  { %v2589_v41 = vpop.f32.mrf.mxu0 }
 0x19f   :  { %v1570_v47 = vadd.f32 %v2588_v37, %v3581_v49  ;;  %v1814_v33 = vmax.f32 %v1726_v40, 0.0 }
 0x1a0   :  { %v2590_v46 = vpop.f32.mrf.mxu0 }
 0x1a1   :  { %v1839_v29 = vpack.c.bf16 %v1814_v33, %v1813_v45  ;;  %v2591_v51 = vadd.f32 %v2590_v46, %v2589_v41  ;;  %v1731_v57 = vadd.f32 %v2697_v1, %v1570_v47  ;;  %v1757_v33 = vpop.f32.mrf.mxu1 }
 0x1a2   :  { %v2592_v52 = vpop.f32.mrf.mxu0 }
 0x1a3   :  { %v1573_v27 = vadd.f32 %v2591_v51, %v3584_v59  ;;  %2743 = vmatprep.mubr.bf16.mxu1 %v1839_v29  ;;  %v1815_v2 = vmax.f32 %v1731_v57, 0.0 }
 0x1a4   :  { %v2593_v42 = vpop.f32.mrf.mxu0 }
 0x1a5   :  { %v1734_v39 = vadd.f32 %v2698_v23, %v1573_v27  ;;  %v2594_v61 = vadd.f32 %v2593_v42, %v2592_v52 }
 0x1a6   :  { %v2595_v58 = vpop.f32.mrf.mxu0 }
 0x1a7   :  { %v1816_v4 = vmax.f32 %v1734_v39, 0.0  ;;  %v1578_v8 = vadd.f32 %v2594_v61, %v3587_v5 }
 0x1a8   :  { %v2596_v49 = vpop.f32.mrf.mxu0 }
 0x1a9   :  { %v2597_v10 = vadd.f32 %v2596_v49, %v2595_v58  ;;  %v1840_v53 = vpack.c.bf16 %v1816_v4, %v1815_v2  ;;  %v1739_v12 = vadd.f32 %v1738_v55, %v1578_v8  ;;  %v2709_v55 = vpop.f32.mrf.mxu1 }
 0x1aa   :  { %v2598_v63 = vpop.f32.mrf.mxu0 }
 0x1ab   :  { %2744 = vmatmul.mubr.bf16.gmra.mxu1 %v1840_v53  ;;  %v1581_v1 = vadd.f32 %v2597_v10, %v3590_v15  ;;  %v1817_v24 = vmax.f32 %v1739_v12, 0.0 }
 0x1ac   :  { %v2599_v59 = vpop.f32.mrf.mxu0 }
 0x1ad   :  { %v2600_v13 = vadd.f32 %v2599_v59, %v2598_v63  ;;  %v1742_v11 = vadd.f32 %v1741_v3, %v1581_v1 }
 0x1ae   :  { %v2601_v17 = vpop.f32.mrf.mxu0 }
 0x1af   :  { %v1586_v21 = vadd.f32 %v2600_v13, %v3593_v26  ;;  %v1818_v23 = vmax.f32 %v1742_v11, 0.0 }
 0x1b0   :  { %v2602_v14 = vpop.f32.mrf.mxu0 }
 0x1b1   :  { %v1841_v5 = vpack.c.bf16 %v1818_v23, %v1817_v24  ;;  %v2603_v25 = vadd.f32 %v2602_v14, %v2601_v17  ;;  %v1747_v30 = vadd.f32 %v2701_v43, %v1586_v21 }
 0x1b2   :  { %v2604_v28 = vpop.f32.mrf.mxu0 }
 0x1b3   :  { %v1589_v32 = vadd.f32 %v2603_v25, %v3596_v36  ;;  %2747 = vmatprep.mubr.bf16.mxu1 %v1841_v5  ;;  %v1819_v18 = vmax.f32 %v1747_v30, 0.0 }
 0x1b4   :  { %v2605_v35 = vpop.f32.mrf.mxu0 }
 0x1b5   :  { %v1750_v15 = vadd.f32 %v2702_v54, %v1589_v32  ;;  %v2606_v38 = vadd.f32 %v2605_v35, %v2604_v28  ;;  %v1770_v54 = vpop.f32.mrf.mxu1 }
 0x1b6   :  { %v2607_v22 = vpop.f32.mrf.mxu0 }
 0x1b7   :  { %v1820_v37 = vmax.f32 %v1750_v15, 0.0  ;;  %v1594_v40 = vadd.f32 %v2606_v38, %v3599_v48  ;;  %v2710_v53 = vpop.f32.mrf.mxu1 }
 0x1b8   :  { %v2608_v26 = vpop.f32.mrf.mxu0 }
 0x1b9   :  { %v1842_v41 = vpack.c.bf16 %v1820_v37, %v1819_v18  ;;  %v2609_v45 = vadd.f32 %v2608_v26, %v2607_v22  ;;  %v1755_v46 = vadd.f32 %v1754_v9, %v1594_v40  ;;  %v1773_v11 = vpop.f32.mrf.mxu1 }
 0x1ba   :  { %v2610_v47 = vpop.f32.mrf.mxu0 }
 0x1bb   :  { %2748 = vmatmul.mubr.bf16.gmra.mxu1 %v1842_v41  ;;  %v1597_v43 = vadd.f32 %v2609_v45, %v3602_v60  ;;  %v1821_v57 = vmax.f32 %v1755_v46, 0.0  ;;  %v2713_v14 = vpop.f32.mrf.mxu1 }
 0x1bc   :  { %v2611_v36 = vpop.f32.mrf.mxu0 }
 0x1bd   :  { %v2612_v29 = vadd.f32 %v2611_v36, %v2610_v47  ;;  %v1758_v51 = vadd.f32 %v1757_v33, %v1597_v43  ;;  %v1786_v35 = vpop.f32.mrf.mxu1 }
 0x1be   :  { %v2613_v52 = vpop.f32.mrf.mxu0 }
 0x1bf   :  { %v1602_v27 = vadd.f32 %v2612_v29, %v3605_v7  ;;  %v1822_v42 = vmax.f32 %v1758_v51, 0.0  ;;  %v2714_v37 = vpop.f32.mrf.mxu1 }
 0x1c0   :  { %v2614_v39 = vpop.f32.mrf.mxu0 }
 0x1c1   :  { %v1843_v48 = vpack.c.bf16 %v1822_v42, %v1821_v57  ;;  %v2615_v61 = vadd.f32 %v2614_v39, %v2613_v52  ;;  %v1763_v2 = vadd.f32 %v2705_v62, %v1602_v27  ;;  %v1789_v46 = vpop.f32.mrf.mxu1 }
 0x1c2   :  { %v2616_v58 = vpop.f32.mrf.mxu0 }
 0x1c3   :  { %v1605_v4 = vadd.f32 %v2615_v61, %v3608_v19  ;;  %2751 = vmatprep.mubr.bf16.mxu1 %v1843_v48  ;;  %v1823_v63 = vmax.f32 %v1763_v2, 0.0 }
 0x1c4   :  { %v2617_v8 = vpop.f32.mrf.mxu0 }
 0x1c5   :  { %v1766_v60 = vadd.f32 %v2706_v16, %v1605_v4  ;;  %v2618_v49 = vadd.f32 %v2617_v8, %v2616_v58 }
 0x1c6   :  { %v2619_v10 = vpop.f32.mrf.mxu0 }
 0x1c7   :  { %v1824_v3 = vmax.f32 %v1766_v60, 0.0  ;;  %v1610_v12 = vadd.f32 %v2618_v49, %v3611_v31 }
 0x1c8   :  { %v2620_v7 = vpop.f32.mrf.mxu0 }
 0x1c9   :  { %v1844_v1 = vpack.c.bf16 %v1824_v3, %v1823_v63  ;;  %v2621_v59 = vadd.f32 %v2620_v7, %v2619_v10  ;;  %v1771_v17 = vadd.f32 %v1770_v54, %v1610_v12 }
 0x1ca   :  { %v2622_v13 = vpop.f32.mrf.mxu0 }
 0x1cb   :  { %2752 = vmatmul.mubr.bf16.gmra.mxu1 %v1844_v1  ;;  %v1613_v62 = vadd.f32 %v2621_v59, %v3614_v44  ;;  %v1825_v5 = vmax.f32 %v1771_v17, 0.0 }
 0x1cc   :  { %v2623_v19 = vpop.f32.mrf.mxu0 }
 0x1cd   :  { %v2624_v24 = vadd.f32 %v2623_v19, %v2622_v13  ;;  %v1774_v21 = vadd.f32 %v1773_v11, %v1613_v62 }
 0x1ce   :  { %v2625_v23 = vpop.f32.mrf.mxu0 }
 0x1cf   :  { %v1618_v25 = vadd.f32 %v2624_v24, %v3617_v56  ;;  %v1826_v28 = vmax.f32 %v1774_v21, 0.0 }
 0x1d0   :  { %v2626_v9 = vpop.f32.mrf.mxu0 }
 0x1d1   :  { %v1845_v31 = vpack.c.bf16 %v1826_v28, %v1825_v5  ;;  %v2627_v30 = vadd.f32 %v2626_v9, %v2625_v23  ;;  %v1779_v15 = vadd.f32 %v2709_v55, %v1618_v25 }
 0x1d2   :  { %v2628_v32 = vpop.f32.mrf.mxu0 }
 0x1d3   :  { %v1621_v38 = vadd.f32 %v2627_v30, %v3620_v6  ;;  %2755 = vmatprep.mubr.bf16.mxu1 %v1845_v31  ;;  %v1827_v40 = vmax.f32 %v1779_v15, 0.0 }
 0x1d4   :  { %v2629_v22 = vpop.f32.mrf.mxu0 }
 0x1d5   :  { %v1782_v44 = vadd.f32 %v2710_v53, %v1621_v38  ;;  %v2630_v16 = vadd.f32 %v2629_v22, %v2628_v32 }
 0x1d6   :  { %v2631_v18 = vpop.f32.mrf.mxu0 }
 0x1d7   :  { %v1828_v26 = vmax.f32 %v1782_v44, 0.0  ;;  %v1626_v41 = vadd.f32 %v2630_v16, %v3623_v20 }
 0x1d8   :  { %v2632_v56 = vpop.f32.mrf.mxu0 }
 0x1d9   :  { %v1846_v45 = vpack.c.bf16 %v1828_v26, %v1827_v40  ;;  %v2633_v47 = vadd.f32 %v2632_v56, %v2631_v18  ;;  %v1787_v43 = vadd.f32 %v1786_v35, %v1626_v41 }
 0x1da   :  { %v2634_v33 = vpop.f32.mrf.mxu0 }
 0x1db   :  { %2756 = vmatmul.mubr.bf16.gmra.mxu1 %v1846_v45  ;;  %v1629_v36 = vadd.f32 %v2633_v47, %v3626_v34  ;;  %v1829_v55 = vmax.f32 %v1787_v43, 0.0  ;;  %v3669_v34 = vld [vmem:[%s3803_s4] ss:$0 sm:$0xff] }
 0x1dc   :  { %v2635_v6 = vpop.f32.mrf.mxu0 }
 0x1dd   :  { %v2636_v29 = vadd.f32 %v2635_v6, %v2634_v33  ;;  %v1790_v51 = vadd.f32 %v1789_v46, %v1629_v36 }
 0x1de   :  { %v2637_v52 = vpop.f32.mrf.mxu0 }
 0x1df   :  { %v1634_v57 = vadd.f32 %v2636_v29, %v3629_v50  ;;  %v1830_v27 = vmax.f32 %v1790_v51, 0.0 }
 0x1e0   :  { %v2638_v42 = vpop.f32.mrf.mxu0 }
 0x1e1   :  { %v1847_v39 = vpack.c.bf16 %v1830_v27, %v1829_v55  ;;  %v2639_v20 = vadd.f32 %v2638_v42, %v2637_v52  ;;  %v1795_v48 = vadd.f32 %v2713_v14, %v1634_v57 }
 0x1e3   :  { %v1637_v61 = vadd.f32 %v2639_v20, %v3632_v0  ;;  %2759 = vmatprep.mubr.bf16.mxu1 %v1847_v39  ;;  %v1831_v54 = vmax.f32 %v1795_v48, 0.0 }
 0x1e5   :  { %v1798_v58 = vadd.f32 %v2714_v37, %v1637_v61 }
 0x1e7   :  { %v1832_v2 = vmax.f32 %v1798_v58, 0.0 }
 0x1e9   :  { %v1848_v4 = vpack.c.bf16 %v1832_v2, %v1831_v54 }
 0x1eb   :  { %2760 = vmatmul.mubr.bf16.gmra.mxu1 %v1848_v4 }
 0x23b   :  { %v2733_v8 = vpop.f32.mrf.mxu1 }
 0x23c   :  { %v1963_v50 = vadd.f32 %v2733_v8, %v3669_v34 }
 0x23d   :  { %v1954_v60 = vpop.f32.mrf.mxu1 }
 0x23e   :  { %2083 = vst [vmem:[%s3804_s5 + $0x10] sm:$0xff] %v1963_v50  ;;  %v1955_v0 = vadd.f32 %v3669_v34, %v1954_v60 }
 0x23f   :  { %v2734_v49 = vpop.f32.mrf.mxu1 }
 0x240   :  { %2081 = vst [vmem:[%s3804_s5] sm:$0xff] %v1955_v0  ;;  %v1966_v10 = vadd.f32 %v2734_v49, %v3669_v34 }
 0x241   :  { %v1957_v53 = vpop.f32.mrf.mxu1 }
 0x242   :  { %2084 = vst [vmem:[%s3804_s5 + $0x18] sm:$0xff] %v1966_v10  ;;  %v1958_v63 = vadd.f32 %v3669_v34, %v1957_v53 }
 0x244   :  { %2082 = vst [vmem:[%s3804_s5 + $0x8] sm:$0xff] %v1958_v63 }
 0x24b   :  { %v2737_v3 = vpop.f32.mrf.mxu1 }
 0x24c   :  { %v1979_v12 = vadd.f32 %v2737_v3, %v3669_v34 }
 0x24d   :  { %v1970_v7 = vpop.f32.mrf.mxu1 }
 0x24e   :  { %2087 = vst [vmem:[%s3804_s5 + $0x30] sm:$0xff] %v1979_v12  ;;  %v1971_v1 = vadd.f32 %v3669_v34, %v1970_v7 }
 0x24f   :  { %v2738_v59 = vpop.f32.mrf.mxu1 }
 0x250   :  { %2085 = vst [vmem:[%s3804_s5 + $0x20] sm:$0xff] %v1971_v1  ;;  %v1982_v13 = vadd.f32 %v2738_v59, %v3669_v34 }
 0x251   :  { %v1973_v11 = vpop.f32.mrf.mxu1 }
 0x252   :  { %2088 = vst [vmem:[%s3804_s5 + $0x38] sm:$0xff] %v1982_v13  ;;  %v1974_v17 = vadd.f32 %v3669_v34, %v1973_v11 }
 0x254   :  { %2086 = vst [vmem:[%s3804_s5 + $0x28] sm:$0xff] %v1974_v17 }
 0x25b   :  { %v2741_v62 = vpop.f32.mrf.mxu1 }
 0x25c   :  { %v1995_v19 = vadd.f32 %v2741_v62, %v3669_v34 }
 0x25d   :  { %v1986_v24 = vpop.f32.mrf.mxu1 }
 0x25e   :  { %2091 = vst [vmem:[%s3804_s5 + $0x50] sm:$0xff] %v1995_v19  ;;  %v1987_v21 = vadd.f32 %v3669_v34, %v1986_v24 }
 0x25f   :  { %v2742_v23 = vpop.f32.mrf.mxu1 }
 0x260   :  { %2089 = vst [vmem:[%s3804_s5 + $0x40] sm:$0xff] %v1987_v21  ;;  %v1998_v14 = vadd.f32 %v2742_v23, %v3669_v34 }
 0x261   :  { %v1989_v5 = vpop.f32.mrf.mxu1 }
 0x262   :  { %2092 = vst [vmem:[%s3804_s5 + $0x58] sm:$0xff] %v1998_v14  ;;  %v1990_v25 = vadd.f32 %v3669_v34, %v1989_v5 }
 0x264   :  { %2090 = vst [vmem:[%s3804_s5 + $0x48] sm:$0xff] %v1990_v25 }
 0x26b   :  { %v2745_v28 = vpop.f32.mrf.mxu1 }
 0x26c   :  { %v2011_v9 = vadd.f32 %v2745_v28, %v3669_v34 }
 0x26d   :  { %v2002_v31 = vpop.f32.mrf.mxu1 }
 0x26e   :  { %2095 = vst [vmem:[%s3804_s5 + $0x70] sm:$0xff] %v2011_v9  ;;  %v2003_v30 = vadd.f32 %v3669_v34, %v2002_v31 }
 0x26f   :  { %v2746_v32 = vpop.f32.mrf.mxu1 }
 0x270   :  { %2093 = vst [vmem:[%s3804_s5 + $0x60] sm:$0xff] %v2003_v30  ;;  %v2014_v35 = vadd.f32 %v2746_v32, %v3669_v34 }
 0x271   :  { %v2005_v15 = vpop.f32.mrf.mxu1 }
 0x272   :  { %2096 = vst [vmem:[%s3804_s5 + $0x78] sm:$0xff] %v2014_v35  ;;  %v2006_v38 = vadd.f32 %v3669_v34, %v2005_v15 }
 0x274   :  { %2094 = vst [vmem:[%s3804_s5 + $0x68] sm:$0xff] %v2006_v38 }
 0x27b   :  { %v2749_v22 = vpop.f32.mrf.mxu1 }
 0x27c   :  { %v2027_v44 = vadd.f32 %v2749_v22, %v3669_v34 }
 0x27d   :  { %v2018_v16 = vpop.f32.mrf.mxu1 }
 0x27e   :  { %2099 = vst [vmem:[%s3804_s5 + $0x90] sm:$0xff] %v2027_v44  ;;  %v2019_v18 = vadd.f32 %v3669_v34, %v2018_v16 }
 0x27f   :  { %v2750_v37 = vpop.f32.mrf.mxu1 }
 0x280   :  { %2097 = vst [vmem:[%s3804_s5 + $0x80] sm:$0xff] %v2019_v18  ;;  %v2030_v40 = vadd.f32 %v2750_v37, %v3669_v34 }
 0x281   :  { %v2021_v26 = vpop.f32.mrf.mxu1 }
 0x282   :  { %2100 = vst [vmem:[%s3804_s5 + $0x98] sm:$0xff] %v2030_v40  ;;  %v2022_v41 = vadd.f32 %v3669_v34, %v2021_v26 }
 0x284   :  { %2098 = vst [vmem:[%s3804_s5 + $0x88] sm:$0xff] %v2022_v41 }
 0x28b   :  { %v2753_v56 = vpop.f32.mrf.mxu1 }
 0x28c   :  { %v2043_v45 = vadd.f32 %v2753_v56, %v3669_v34 }
 0x28d   :  { %v2034_v47 = vpop.f32.mrf.mxu1 }
 0x28e   :  { %2103 = vst [vmem:[%s3804_s5 + $0xb0] sm:$0xff] %v2043_v45  ;;  %v2035_v33 = vadd.f32 %v3669_v34, %v2034_v47 }
 0x28f   :  { %v2754_v46 = vpop.f32.mrf.mxu1 }
 0x290   :  { %2101 = vst [vmem:[%s3804_s5 + $0xa0] sm:$0xff] %v2035_v33  ;;  %v2046_v43 = vadd.f32 %v2754_v46, %v3669_v34 }
 0x291   :  { %v2037_v36 = vpop.f32.mrf.mxu1 }
 0x292   :  { %2104 = vst [vmem:[%s3804_s5 + $0xb8] sm:$0xff] %v2046_v43  ;;  %v2038_v6 = vadd.f32 %v3669_v34, %v2037_v36 }
 0x294   :  { %2102 = vst [vmem:[%s3804_s5 + $0xa8] sm:$0xff] %v2038_v6 }
 0x29b   :  { %v2757_v29 = vpop.f32.mrf.mxu1 }
 0x29c   :  { %v2059_v51 = vadd.f32 %v2757_v29, %v3669_v34 }
 0x29d   :  { %v2050_v52 = vpop.f32.mrf.mxu1 }
 0x29e   :  { %2107 = vst [vmem:[%s3804_s5 + $0xd0] sm:$0xff] %v2059_v51  ;;  %v2051_v55 = vadd.f32 %v3669_v34, %v2050_v52 }
 0x29f   :  { %v2758_v57 = vpop.f32.mrf.mxu1 }
 0x2a0   :  { %2105 = vst [vmem:[%s3804_s5 + $0xc0] sm:$0xff] %v2051_v55  ;;  %v2062_v27 = vadd.f32 %v2758_v57, %v3669_v34 }
 0x2a1   :  { %v2053_v42 = vpop.f32.mrf.mxu1 }
 0x2a2   :  { %2108 = vst [vmem:[%s3804_s5 + $0xd8] sm:$0xff] %v2062_v27  ;;  %v2054_v39 = vadd.f32 %v3669_v34, %v2053_v42 }
 0x2a4   :  { %2106 = vst [vmem:[%s3804_s5 + $0xc8] sm:$0xff] %v2054_v39 }
 0x2ab   :  { %v2761_v20 = vpop.f32.mrf.mxu1 }
 0x2ac   :  { %v2075_v48 = vadd.f32 %v2761_v20, %v3669_v34 }
 0x2ad   :  { %v2066_v61 = vpop.f32.mrf.mxu1 }
 0x2ae   :  { %2111 = vst [vmem:[%s3804_s5 + $0xf0] sm:$0xff] %v2075_v48  ;;  %v2067_v58 = vadd.f32 %v3669_v34, %v2066_v61 }
 0x2af   :  { %v2762_v54 = vpop.f32.mrf.mxu1 }
 0x2b0   :  { %2109 = vst [vmem:[%s3804_s5 + $0xe0] sm:$0xff] %v2067_v58  ;;  %v2078_v2 = vadd.f32 %v2762_v54, %v3669_v34 }
 0x2b1   :  { %v2069_v4 = vpop.f32.mrf.mxu1 }
 0x2b2   :  { %2112 = vst [vmem:[%s3804_s5 + $0xf8] sm:$0xff] %v2078_v2  ;;  %v2070_v8 = vadd.f32 %v3669_v34, %v2069_v4 }
 0x2b4   :  { %2110 = vst [vmem:[%s3804_s5 + $0xe8] sm:$0xff] %v2070_v8 }

</bundles_post_ra>
